<compile_context>
chip_gen: v5e
topology: v5e:2x2
jax: 0.10.0
libtpu: 0.0.40
codegen_flags: <defaults>
</compile_context>

<pallas_src>
import functools

import jax
import jax.numpy as jnp
from jax.experimental import pallas as pl
from jax.experimental.pallas import tpu as pltpu


# ----------------------------------------------------------------------------
# Fused kernel: maxpool(2) -> conv3x3+ReLU -> conv3x3+ReLU  (one batch / step)
# ----------------------------------------------------------------------------
def _down_fused_kernel(x_ref, w1_ref, b1_ref, w2_ref, b2_ref, o_ref,
                       pool_ref, y1_ref, *, Ho, Wo, Cin, Cout):
    # x_ref   : (1, Ho, 2, Wo, 2*Cin)  bf16  NHWC input, 2x2 pool window folded
    # w1_ref  : (3, 3*Cin,  Cout)      bf16  conv1 weights, [dy][dx,ci]
    # b1_ref  : (1, Cout)              f32
    # w2_ref  : (3, 3*Cout, Cout)      bf16  conv2 weights
    # b2_ref  : (1, Cout)              f32
    # o_ref   : (1, Cout, Ho*Wo)       f32   final output, NCHW-flat
    # pool_ref: (Ho+2, Wpad, Cin)      bf16  scratch: pooled act + zero halo
    # y1_ref  : (Ho+2, Wpad, Cout)     bf16  scratch: conv1 act + zero halo

    def zero_halo(ref):
        # Only the 1-px border (plus the sublane-alignment pad columns, which
        # are never read) — the interior is fully rewritten every step.
        hpad, wpad, c = ref.shape
        ref[0] = jnp.zeros((wpad, c), ref.dtype)                    # top row
        ref[Ho + 1] = jnp.zeros((wpad, c), ref.dtype)               # bottom row
        ref[:, 0:1, :] = jnp.zeros((hpad, 1, c), ref.dtype)         # left col
        ref[:, Wo + 1:, :] = jnp.zeros((hpad, wpad - Wo - 1, c), ref.dtype)

    # ---- 2x2 max pool, stride 2 (registers -> bf16 VMEM scratch) ----------
    xa = x_ref[0]                                          # (Ho, 2, Wo, 2*Cin)
    rows = jnp.maximum(xa[:, 0], xa[:, 1])                 # row-pair max
    pooled = jnp.maximum(rows[..., :Cin], rows[..., Cin:])  # col-pair max -> (Ho, Wo, Cin)

    zero_halo(pool_ref)
    pool_ref[1:Ho + 1, 1:Wo + 1, :] = pooled

    def conv3x3_relu(src_ref, w_ref, b_ref, cin):
        # 3 accumulated dots with K = 3*cin (one per kernel row dy) instead of
        # one 9*cin im2col: bounds the patch temp and keeps the MXU fed.
        acc = None
        for dy in range(3):
            taps = [src_ref[dy:dy + Ho, dx:dx + Wo, :]
                    for dx in range(3)]                     # each (Ho, Wo, cin) bf16
            patches = jnp.concatenate(taps, axis=-1)        # (Ho, Wo, 3*cin)
            patches = patches.reshape(Ho * Wo, 3 * cin)
            part = jnp.dot(patches, w_ref[dy],
                           preferred_element_type=jnp.float32)  # (Ho*Wo, Cout) f32
            acc = part if acc is None else acc + part
        return jnp.maximum(acc + b_ref[...], 0.0)           # f32

    # ---- conv1 + ReLU (kept in VMEM scratch, never to HBM) -----------------
    y1 = conv3x3_relu(pool_ref, w1_ref, b1_ref, Cin)        # (Ho*Wo, Cout) f32
    zero_halo(y1_ref)
    y1_ref[1:Ho + 1, 1:Wo + 1, :] = y1.reshape(Ho, Wo, Cout).astype(y1_ref.dtype)

    # ---- conv2 + ReLU -------------------------------------------------------
    y2 = conv3x3_relu(y1_ref, w2_ref, b2_ref, Cout)         # (Ho*Wo, Cout) f32

    # ---- write NCHW-flat: lane axis = Ho*Wo (lane-dense for real images) ----
    o_ref[0] = y2.T.astype(o_ref.dtype)                     # (Cout, Ho*Wo)


def down_fused(x_nchw, w1, b1, w2, b2):
    """x_nchw: (N, Cin, H, W) f32; w: HWIO (3,3,Ci,Co); returns (N, Cout, H//2, W//2) f32."""
    N, Cin, H, W = x_nchw.shape
    Cout = w1.shape[-1]
    assert H % 2 == 0 and W % 2 == 0, "Down expects even spatial dims"
    Ho, Wo = H // 2, W // 2
    Wpad = max(8, ((Wo + 2 + 7) // 8) * 8)   # sublane-aligned scratch W extent

    # One XLA transpose+cast of the raw input (NCHW -> NHWC bf16); the reshape
    # folding the 2x2 pool window into (row-pair axis, lane-pair) is free.
    x = jnp.transpose(x_nchw, (0, 2, 3, 1)).astype(jnp.bfloat16)
    x = x.reshape(N, Ho, 2, Wo, 2 * Cin)

    # Weights as (3, 3*C, Cout): per-dy slab is a clean leading-dim index in-kernel.
    w1r = w1.astype(jnp.bfloat16).reshape(3, 3 * Cin, Cout)
    w2r = w2.astype(jnp.bfloat16).reshape(3, 3 * Cout, Cout)
    b1r = b1.reshape(1, Cout).astype(jnp.float32)
    b2r = b2.reshape(1, Cout).astype(jnp.float32)

    kernel = functools.partial(_down_fused_kernel, Ho=Ho, Wo=Wo, Cin=Cin, Cout=Cout)

    out_flat = pl.pallas_call(
        kernel,
        out_shape=jax.ShapeDtypeStruct((N, Cout, Ho * Wo), x_nchw.dtype),
        grid=(N,),
        in_specs=[
            pl.BlockSpec((1, Ho, 2, Wo, 2 * Cin), lambda n: (n, 0, 0, 0, 0)),
            pl.BlockSpec((3, 3 * Cin, Cout), lambda n: (0, 0, 0)),
            pl.BlockSpec((1, Cout), lambda n: (0, 0)),
            pl.BlockSpec((3, 3 * Cout, Cout), lambda n: (0, 0, 0)),
            pl.BlockSpec((1, Cout), lambda n: (0, 0)),
        ],
        out_specs=pl.BlockSpec((1, Cout, Ho * Wo), lambda n: (n, 0, 0)),
        scratch_shapes=[
            pltpu.VMEM((Ho + 2, Wpad, Cin), jnp.bfloat16),    # pooled + halo
            pltpu.VMEM((Ho + 2, Wpad, Cout), jnp.bfloat16),   # conv1 out + halo
        ],
        compiler_params=pltpu.CompilerParams(
            dimension_semantics=("parallel",)),
    )(x, w1r, b1r, w2r, b2r)

    # NCHW-flat -> NCHW: pure metadata reshape, no data movement.
    return out_flat.reshape(N, Cout, Ho, Wo)


# ----------------------------------------------------------------------------
# Down module: params + forward
# ----------------------------------------------------------------------------
def init_down_params(key, in_channels, out_channels):
    """PyTorch Conv2d-style U(-1/sqrt(fan_in), 1/sqrt(fan_in)); weights HWIO."""
    k1, k2, k3, k4 = jax.random.split(key, 4)
    bnd1 = 1.0 / jnp.sqrt(in_channels * 9)
    bnd2 = 1.0 / jnp.sqrt(out_channels * 9)
    return {
        "w1": jax.random.uniform(k1, (3, 3, in_channels, out_channels),
                                 jnp.float32, -bnd1, bnd1),
        "b1": jax.random.uniform(k2, (out_channels,), jnp.float32, -bnd1, bnd1),
        "w2": jax.random.uniform(k3, (3, 3, out_channels, out_channels),
                                 jnp.float32, -bnd2, bnd2),
        "b2": jax.random.uniform(k4, (out_channels,), jnp.float32, -bnd2, bnd2),
    }


@jax.jit
def down_forward(x_nchw, params):
    return down_fused(x_nchw, params["w1"], params["b1"],
                      params["w2"], params["b2"])


# ----------------------------------------------------------------------------
# Pure-JAX reference (correctness check only)
# ----------------------------------------------------------------------------
def down_reference(x_nchw, params):
    x = jnp.transpose(x_nchw, (0, 2, 3, 1))                  # NHWC
    N, H, W, C = x.shape
    x = x.reshape(N, H // 2, 2, W // 2, 2, C).max(axis=(2, 4))

    def conv(x, w, b):
        y = jax.lax.conv_general_dilated(
            x, w, window_strides=(1, 1), padding="SAME",
            dimension_numbers=("NHWC", "HWIO", "NHWC"))
        return jnp.maximum(y + b, 0.0)

    x = conv(x, params["w1"], params["b1"])
    x = conv(x, params["w2"], params["b2"])
    return jnp.transpose(x, (0, 3, 1, 2))


if __name__ == "__main__":
    batch, in_ch, out_ch, spatial = 2, 4, 8, 16
    key = jax.random.PRNGKey(0)
    kx, kp = jax.random.split(key)
    x = jax.random.normal(kx, (batch, in_ch, spatial, spatial), jnp.float32)
    params = init_down_params(kp, in_ch, out_ch)

    out = jax.block_until_ready(down_forward(x, params))
    ref = down_reference(x, params)

    assert out.shape == (batch, out_ch, spatial // 2, spatial // 2), out.shape
    # bf16 MXU operands -> looser tolerance than the pure-f32 version.
    assert jnp.allclose(out, ref, atol=3e-2, rtol=3e-2), float(
        jnp.max(jnp.abs(out - ref)))

    print("KERNEL_OK")
</pallas_src>

<mosaic_0001>
module attributes {stable_mosaic.version = 11 : i64} {
  func.func @_down_fused_kernel(%arg0: i32, %arg1: memref<1x8x2x8x8xbf16, #tpu.memory_space<vmem>>, %arg2: memref<3x12x8xbf16, #tpu.memory_space<vmem>>, %arg3: memref<1x8xf32, #tpu.memory_space<vmem>>, %arg4: memref<3x24x8xbf16, #tpu.memory_space<vmem>>, %arg5: memref<1x8xf32, #tpu.memory_space<vmem>>, %arg6: memref<1x8x64xf32, #tpu.memory_space<vmem>>, %arg7: memref<10x16x4xbf16, #tpu.memory_space<vmem>>, %arg8: memref<10x16x8xbf16, #tpu.memory_space<vmem>>) attributes {dimension_semantics = [#tpu.dimension_semantics<parallel>], iteration_bounds = array<i64: 2>, scalar_prefetch = 0 : i64, scratch_operands = 2 : i64, tpu.core_type = #tpu.core_type<tc>, window_params = [{transform_indices = @transform_0, window_bounds = array<i64: 1, 8, 2, 8, 8>}, {pipeline_mode = #tpu.pipeline_mode<synchronous>, transform_indices = @transform_1, window_bounds = array<i64: 3, 12, 8>}, {pipeline_mode = #tpu.pipeline_mode<synchronous>, transform_indices = @transform_2, window_bounds = array<i64: 1, 8>}, {pipeline_mode = #tpu.pipeline_mode<synchronous>, transform_indices = @transform_3, window_bounds = array<i64: 3, 24, 8>}, {pipeline_mode = #tpu.pipeline_mode<synchronous>, transform_indices = @transform_4, window_bounds = array<i64: 1, 8>}, {transform_indices = @transform_5, window_bounds = array<i64: 1, 8, 64>}]} {
    %c0 = arith.constant 0 : index
    %c0_0 = arith.constant 0 : index
    %c0_1 = arith.constant 0 : index
    %c0_2 = arith.constant 0 : index
    %c0_3 = arith.constant 0 : index
    %0 = vector.load %arg1[%c0, %c0_0, %c0_1, %c0_2, %c0_3] : memref<1x8x2x8x8xbf16, #tpu.memory_space<vmem>>, vector<1x8x2x8x8xbf16>
    %1 = vector.shape_cast %0 : vector<1x8x2x8x8xbf16> to vector<8x2x8x8xbf16>
    %2 = vector.extract_strided_slice %1 {offsets = [0, 0, 0, 0], sizes = [8, 1, 8, 8], strides = [1, 1, 1, 1]} : vector<8x2x8x8xbf16> to vector<8x1x8x8xbf16>
    %3 = vector.shape_cast %2 : vector<8x1x8x8xbf16> to vector<8x8x8xbf16>
    %4 = vector.extract_strided_slice %1 {offsets = [0, 1, 0, 0], sizes = [8, 1, 8, 8], strides = [1, 1, 1, 1]} : vector<8x2x8x8xbf16> to vector<8x1x8x8xbf16>
    %5 = vector.shape_cast %4 : vector<8x1x8x8xbf16> to vector<8x8x8xbf16>
    %6 = arith.maximumf %3, %5 : vector<8x8x8xbf16>
    %7 = vector.extract_strided_slice %6 {offsets = [0, 0, 0], sizes = [8, 8, 4], strides = [1, 1, 1]} : vector<8x8x8xbf16> to vector<8x8x4xbf16>
    %8 = vector.extract_strided_slice %6 {offsets = [0, 0, 4], sizes = [8, 8, 4], strides = [1, 1, 1]} : vector<8x8x8xbf16> to vector<8x8x4xbf16>
    %9 = arith.maximumf %7, %8 : vector<8x8x4xbf16>
    %cst = arith.constant 0.000000e+00 : bf16
    %10 = vector.broadcast %cst : bf16 to vector<16x4xbf16>
    %c0_4 = arith.constant 0 : index
    %c0_5 = arith.constant 0 : index
    %c0_6 = arith.constant 0 : index
    %11 = vector.load %arg7[%c0_4, %c0_5, %c0_6] : memref<10x16x4xbf16, #tpu.memory_space<vmem>>, vector<1x16x4xbf16>
    %12 = vector.shape_cast %11 : vector<1x16x4xbf16> to vector<16x4xbf16>
    %13 = vector.shape_cast %10 : vector<16x4xbf16> to vector<1x16x4xbf16>
    tpu.vector_store %arg7[%c0_4, %c0_5, %c0_6], %13 {strides = array<i32>} : memref<10x16x4xbf16, #tpu.memory_space<vmem>>, vector<1x16x4xbf16>,
    %cst_7 = arith.constant 0.000000e+00 : bf16
    %14 = vector.broadcast %cst_7 : bf16 to vector<16x4xbf16>
    %c9 = arith.constant 9 : index
    %c0_8 = arith.constant 0 : index
    %c0_9 = arith.constant 0 : index
    %15 = vector.load %arg7[%c9, %c0_8, %c0_9] : memref<10x16x4xbf16, #tpu.memory_space<vmem>>, vector<1x16x4xbf16>
    %16 = vector.shape_cast %15 : vector<1x16x4xbf16> to vector<16x4xbf16>
    %17 = vector.shape_cast %14 : vector<16x4xbf16> to vector<1x16x4xbf16>
    tpu.vector_store %arg7[%c9, %c0_8, %c0_9], %17 {strides = array<i32>} : memref<10x16x4xbf16, #tpu.memory_space<vmem>>, vector<1x16x4xbf16>,
    %cst_10 = arith.constant 0.000000e+00 : bf16
    %18 = vector.broadcast %cst_10 : bf16 to vector<10x1x4xbf16>
    %c0_11 = arith.constant 0 : index
    %c0_12 = arith.constant 0 : index
    %c0_13 = arith.constant 0 : index
    %19 = vector.load %arg7[%c0_11, %c0_12, %c0_13] : memref<10x16x4xbf16, #tpu.memory_space<vmem>>, vector<10x1x4xbf16>
    tpu.vector_store %arg7[%c0_11, %c0_12, %c0_13], %18 {strides = array<i32>} : memref<10x16x4xbf16, #tpu.memory_space<vmem>>, vector<10x1x4xbf16>,
    %cst_14 = arith.constant 0.000000e+00 : bf16
    %20 = vector.broadcast %cst_14 : bf16 to vector<10x7x4xbf16>
    %c0_15 = arith.constant 0 : index
    %c9_16 = arith.constant 9 : index
    %c0_17 = arith.constant 0 : index
    %21 = vector.load %arg7[%c0_15, %c9_16, %c0_17] : memref<10x16x4xbf16, #tpu.memory_space<vmem>>, vector<10x7x4xbf16>
    tpu.vector_store %arg7[%c0_15, %c9_16, %c0_17], %20 {strides = array<i32>} : memref<10x16x4xbf16, #tpu.memory_space<vmem>>, vector<10x7x4xbf16>,
    %c1 = arith.constant 1 : index
    %c1_18 = arith.constant 1 : index
    %c0_19 = arith.constant 0 : index
    %22 = vector.load %arg7[%c1, %c1_18, %c0_19] : memref<10x16x4xbf16, #tpu.memory_space<vmem>>, vector<8x8x4xbf16>
    tpu.vector_store %arg7[%c1, %c1_18, %c0_19], %9 {strides = array<i32>} : memref<10x16x4xbf16, #tpu.memory_space<vmem>>, vector<8x8x4xbf16>,
    %c0_20 = arith.constant 0 : index
    %c0_21 = arith.constant 0 : index
    %c0_22 = arith.constant 0 : index
    %23 = vector.load %arg7[%c0_20, %c0_21, %c0_22] : memref<10x16x4xbf16, #tpu.memory_space<vmem>>, vector<8x8x4xbf16>
    %c0_23 = arith.constant 0 : index
    %c1_24 = arith.constant 1 : index
    %c0_25 = arith.constant 0 : index
    %24 = vector.load %arg7[%c0_23, %c1_24, %c0_25] : memref<10x16x4xbf16, #tpu.memory_space<vmem>>, vector<8x8x4xbf16>
    %c0_26 = arith.constant 0 : index
    %c2 = arith.constant 2 : index
    %c0_27 = arith.constant 0 : index
    %25 = vector.load %arg7[%c0_26, %c2, %c0_27] : memref<10x16x4xbf16, #tpu.memory_space<vmem>>, vector<8x8x4xbf16>
    %26 = tpu.concatenate %23, %24, %25 in 2 : vector<8x8x4xbf16>, vector<8x8x4xbf16>, vector<8x8x4xbf16> -> vector<8x8x12xbf16>
    %27 = vector.shape_cast %26 : vector<8x8x12xbf16> to vector<64x12xbf16>
    %c0_28 = arith.constant 0 : index
    %c0_29 = arith.constant 0 : index
    %c0_30 = arith.constant 0 : index
    %28 = vector.load %arg2[%c0_28, %c0_29, %c0_30] : memref<3x12x8xbf16, #tpu.memory_space<vmem>>, vector<1x12x8xbf16>
    %29 = vector.shape_cast %28 : vector<1x12x8xbf16> to vector<12x8xbf16>
    %cst_31 = arith.constant dense<0.000000e+00> : vector<64x8xf32>
    %30 = tpu.matmul %27, %29, %cst_31 {dimension_numbers = #tpu.dot_dimension_numbers<[1], [0], [0], [1], [0, 0, 1, 1], [], []>} : vector<64x12xbf16>, vector<12x8xbf16>, vector<64x8xf32> -> vector<64x8xf32>
    %c1_32 = arith.constant 1 : index
    %c0_33 = arith.constant 0 : index
    %c0_34 = arith.constant 0 : index
    %31 = vector.load %arg7[%c1_32, %c0_33, %c0_34] : memref<10x16x4xbf16, #tpu.memory_space<vmem>>, vector<8x8x4xbf16>
    %c1_35 = arith.constant 1 : index
    %c1_36 = arith.constant 1 : index
    %c0_37 = arith.constant 0 : index
    %32 = vector.load %arg7[%c1_35, %c1_36, %c0_37] : memref<10x16x4xbf16, #tpu.memory_space<vmem>>, vector<8x8x4xbf16>
    %c1_38 = arith.constant 1 : index
    %c2_39 = arith.constant 2 : index
    %c0_40 = arith.constant 0 : index
    %33 = vector.load %arg7[%c1_38, %c2_39, %c0_40] : memref<10x16x4xbf16, #tpu.memory_space<vmem>>, vector<8x8x4xbf16>
    %34 = tpu.concatenate %31, %32, %33 in 2 : vector<8x8x4xbf16>, vector<8x8x4xbf16>, vector<8x8x4xbf16> -> vector<8x8x12xbf16>
    %35 = vector.shape_cast %34 : vector<8x8x12xbf16> to vector<64x12xbf16>
    %c1_41 = arith.constant 1 : index
    %c0_42 = arith.constant 0 : index
    %c0_43 = arith.constant 0 : index
    %36 = vector.load %arg2[%c1_41, %c0_42, %c0_43] : memref<3x12x8xbf16, #tpu.memory_space<vmem>>, vector<1x12x8xbf16>
    %37 = vector.shape_cast %36 : vector<1x12x8xbf16> to vector<12x8xbf16>
    %cst_44 = arith.constant dense<0.000000e+00> : vector<64x8xf32>
    %38 = tpu.matmul %35, %37, %cst_44 {dimension_numbers = #tpu.dot_dimension_numbers<[1], [0], [0], [1], [0, 0, 1, 1], [], []>} : vector<64x12xbf16>, vector<12x8xbf16>, vector<64x8xf32> -> vector<64x8xf32>
    %39 = arith.addf %30, %38 : vector<64x8xf32>
    %c2_45 = arith.constant 2 : index
    %c0_46 = arith.constant 0 : index
    %c0_47 = arith.constant 0 : index
    %40 = vector.load %arg7[%c2_45, %c0_46, %c0_47] : memref<10x16x4xbf16, #tpu.memory_space<vmem>>, vector<8x8x4xbf16>
    %c2_48 = arith.constant 2 : index
    %c1_49 = arith.constant 1 : index
    %c0_50 = arith.constant 0 : index
    %41 = vector.load %arg7[%c2_48, %c1_49, %c0_50] : memref<10x16x4xbf16, #tpu.memory_space<vmem>>, vector<8x8x4xbf16>
    %c2_51 = arith.constant 2 : index
    %c2_52 = arith.constant 2 : index
    %c0_53 = arith.constant 0 : index
    %42 = vector.load %arg7[%c2_51, %c2_52, %c0_53] : memref<10x16x4xbf16, #tpu.memory_space<vmem>>, vector<8x8x4xbf16>
    %43 = tpu.concatenate %40, %41, %42 in 2 : vector<8x8x4xbf16>, vector<8x8x4xbf16>, vector<8x8x4xbf16> -> vector<8x8x12xbf16>
    %44 = vector.shape_cast %43 : vector<8x8x12xbf16> to vector<64x12xbf16>
    %c2_54 = arith.constant 2 : index
    %c0_55 = arith.constant 0 : index
    %c0_56 = arith.constant 0 : index
    %45 = vector.load %arg2[%c2_54, %c0_55, %c0_56] : memref<3x12x8xbf16, #tpu.memory_space<vmem>>, vector<1x12x8xbf16>
    %46 = vector.shape_cast %45 : vector<1x12x8xbf16> to vector<12x8xbf16>
    %cst_57 = arith.constant dense<0.000000e+00> : vector<64x8xf32>
    %47 = tpu.matmul %44, %46, %cst_57 {dimension_numbers = #tpu.dot_dimension_numbers<[1], [0], [0], [1], [0, 0, 1, 1], [], []>} : vector<64x12xbf16>, vector<12x8xbf16>, vector<64x8xf32> -> vector<64x8xf32>
    %48 = arith.addf %39, %47 : vector<64x8xf32>
    %c0_58 = arith.constant 0 : index
    %c0_59 = arith.constant 0 : index
    %49 = vector.load %arg3[%c0_58, %c0_59] : memref<1x8xf32, #tpu.memory_space<vmem>>, vector<1x8xf32>
    %50 = vector.broadcast %49 : vector<1x8xf32> to vector<64x8xf32>
    %51 = arith.addf %48, %50 : vector<64x8xf32>
    %cst_60 = arith.constant 0.000000e+00 : f32
    %52 = vector.broadcast %cst_60 : f32 to vector<64x8xf32>
    %53 = arith.maximumf %51, %52 : vector<64x8xf32>
    %cst_61 = arith.constant 0.000000e+00 : bf16
    %54 = vector.broadcast %cst_61 : bf16 to vector<16x8xbf16>
    %c0_62 = arith.constant 0 : index
    %c0_63 = arith.constant 0 : index
    %c0_64 = arith.constant 0 : index
    %55 = vector.load %arg8[%c0_62, %c0_63, %c0_64] : memref<10x16x8xbf16, #tpu.memory_space<vmem>>, vector<1x16x8xbf16>
    %56 = vector.shape_cast %55 : vector<1x16x8xbf16> to vector<16x8xbf16>
    %57 = vector.shape_cast %54 : vector<16x8xbf16> to vector<1x16x8xbf16>
    tpu.vector_store %arg8[%c0_62, %c0_63, %c0_64], %57 {strides = array<i32>} : memref<10x16x8xbf16, #tpu.memory_space<vmem>>, vector<1x16x8xbf16>,
    %cst_65 = arith.constant 0.000000e+00 : bf16
    %58 = vector.broadcast %cst_65 : bf16 to vector<16x8xbf16>
    %c9_66 = arith.constant 9 : index
    %c0_67 = arith.constant 0 : index
    %c0_68 = arith.constant 0 : index
    %59 = vector.load %arg8[%c9_66, %c0_67, %c0_68] : memref<10x16x8xbf16, #tpu.memory_space<vmem>>, vector<1x16x8xbf16>
    %60 = vector.shape_cast %59 : vector<1x16x8xbf16> to vector<16x8xbf16>
    %61 = vector.shape_cast %58 : vector<16x8xbf16> to vector<1x16x8xbf16>
    tpu.vector_store %arg8[%c9_66, %c0_67, %c0_68], %61 {strides = array<i32>} : memref<10x16x8xbf16, #tpu.memory_space<vmem>>, vector<1x16x8xbf16>,
    %cst_69 = arith.constant 0.000000e+00 : bf16
    %62 = vector.broadcast %cst_69 : bf16 to vector<10x1x8xbf16>
    %c0_70 = arith.constant 0 : index
    %c0_71 = arith.constant 0 : index
    %c0_72 = arith.constant 0 : index
    %63 = vector.load %arg8[%c0_70, %c0_71, %c0_72] : memref<10x16x8xbf16, #tpu.memory_space<vmem>>, vector<10x1x8xbf16>
    tpu.vector_store %arg8[%c0_70, %c0_71, %c0_72], %62 {strides = array<i32>} : memref<10x16x8xbf16, #tpu.memory_space<vmem>>, vector<10x1x8xbf16>,
    %cst_73 = arith.constant 0.000000e+00 : bf16
    %64 = vector.broadcast %cst_73 : bf16 to vector<10x7x8xbf16>
    %c0_74 = arith.constant 0 : index
    %c9_75 = arith.constant 9 : index
    %c0_76 = arith.constant 0 : index
    %65 = vector.load %arg8[%c0_74, %c9_75, %c0_76] : memref<10x16x8xbf16, #tpu.memory_space<vmem>>, vector<10x7x8xbf16>
    tpu.vector_store %arg8[%c0_74, %c9_75, %c0_76], %64 {strides = array<i32>} : memref<10x16x8xbf16, #tpu.memory_space<vmem>>, vector<10x7x8xbf16>,
    %66 = vector.shape_cast %53 : vector<64x8xf32> to vector<8x8x8xf32>
    %67 = arith.truncf %66 : vector<8x8x8xf32> to vector<8x8x8xbf16>
    %c1_77 = arith.constant 1 : index
    %c1_78 = arith.constant 1 : index
    %c0_79 = arith.constant 0 : index
    %68 = vector.load %arg8[%c1_77, %c1_78, %c0_79] : memref<10x16x8xbf16, #tpu.memory_space<vmem>>, vector<8x8x8xbf16>
    tpu.vector_store %arg8[%c1_77, %c1_78, %c0_79], %67 {strides = array<i32>} : memref<10x16x8xbf16, #tpu.memory_space<vmem>>, vector<8x8x8xbf16>,
    %c0_80 = arith.constant 0 : index
    %c0_81 = arith.constant 0 : index
    %c0_82 = arith.constant 0 : index
    %69 = vector.load %arg8[%c0_80, %c0_81, %c0_82] : memref<10x16x8xbf16, #tpu.memory_space<vmem>>, vector<8x8x8xbf16>
    %c0_83 = arith.constant 0 : index
    %c1_84 = arith.constant 1 : index
    %c0_85 = arith.constant 0 : index
    %70 = vector.load %arg8[%c0_83, %c1_84, %c0_85] : memref<10x16x8xbf16, #tpu.memory_space<vmem>>, vector<8x8x8xbf16>
    %c0_86 = arith.constant 0 : index
    %c2_87 = arith.constant 2 : index
    %c0_88 = arith.constant 0 : index
    %71 = vector.load %arg8[%c0_86, %c2_87, %c0_88] : memref<10x16x8xbf16, #tpu.memory_space<vmem>>, vector<8x8x8xbf16>
    %72 = tpu.concatenate %69, %70, %71 in 2 : vector<8x8x8xbf16>, vector<8x8x8xbf16>, vector<8x8x8xbf16> -> vector<8x8x24xbf16>
    %73 = vector.shape_cast %72 : vector<8x8x24xbf16> to vector<64x24xbf16>
    %c0_89 = arith.constant 0 : index
    %c0_90 = arith.constant 0 : index
    %c0_91 = arith.constant 0 : index
    %74 = vector.load %arg4[%c0_89, %c0_90, %c0_91] : memref<3x24x8xbf16, #tpu.memory_space<vmem>>, vector<1x24x8xbf16>
    %75 = vector.shape_cast %74 : vector<1x24x8xbf16> to vector<24x8xbf16>
    %cst_92 = arith.constant dense<0.000000e+00> : vector<64x8xf32>
    %76 = tpu.matmul %73, %75, %cst_92 {dimension_numbers = #tpu.dot_dimension_numbers<[1], [0], [0], [1], [0, 0, 1, 1], [], []>} : vector<64x24xbf16>, vector<24x8xbf16>, vector<64x8xf32> -> vector<64x8xf32>
    %c1_93 = arith.constant 1 : index
    %c0_94 = arith.constant 0 : index
    %c0_95 = arith.constant 0 : index
    %77 = vector.load %arg8[%c1_93, %c0_94, %c0_95] : memref<10x16x8xbf16, #tpu.memory_space<vmem>>, vector<8x8x8xbf16>
    %c1_96 = arith.constant 1 : index
    %c1_97 = arith.constant 1 : index
    %c0_98 = arith.constant 0 : index
    %78 = vector.load %arg8[%c1_96, %c1_97, %c0_98] : memref<10x16x8xbf16, #tpu.memory_space<vmem>>, vector<8x8x8xbf16>
    %c1_99 = arith.constant 1 : index
    %c2_100 = arith.constant 2 : index
    %c0_101 = arith.constant 0 : index
    %79 = vector.load %arg8[%c1_99, %c2_100, %c0_101] : memref<10x16x8xbf16, #tpu.memory_space<vmem>>, vector<8x8x8xbf16>
    %80 = tpu.concatenate %77, %78, %79 in 2 : vector<8x8x8xbf16>, vector<8x8x8xbf16>, vector<8x8x8xbf16> -> vector<8x8x24xbf16>
    %81 = vector.shape_cast %80 : vector<8x8x24xbf16> to vector<64x24xbf16>
    %c1_102 = arith.constant 1 : index
    %c0_103 = arith.constant 0 : index
    %c0_104 = arith.constant 0 : index
    %82 = vector.load %arg4[%c1_102, %c0_103, %c0_104] : memref<3x24x8xbf16, #tpu.memory_space<vmem>>, vector<1x24x8xbf16>
    %83 = vector.shape_cast %82 : vector<1x24x8xbf16> to vector<24x8xbf16>
    %cst_105 = arith.constant dense<0.000000e+00> : vector<64x8xf32>
    %84 = tpu.matmul %81, %83, %cst_105 {dimension_numbers = #tpu.dot_dimension_numbers<[1], [0], [0], [1], [0, 0, 1, 1], [], []>} : vector<64x24xbf16>, vector<24x8xbf16>, vector<64x8xf32> -> vector<64x8xf32>
    %85 = arith.addf %76, %84 : vector<64x8xf32>
    %c2_106 = arith.constant 2 : index
    %c0_107 = arith.constant 0 : index
    %c0_108 = arith.constant 0 : index
    %86 = vector.load %arg8[%c2_106, %c0_107, %c0_108] : memref<10x16x8xbf16, #tpu.memory_space<vmem>>, vector<8x8x8xbf16>
    %c2_109 = arith.constant 2 : index
    %c1_110 = arith.constant 1 : index
    %c0_111 = arith.constant 0 : index
    %87 = vector.load %arg8[%c2_109, %c1_110, %c0_111] : memref<10x16x8xbf16, #tpu.memory_space<vmem>>, vector<8x8x8xbf16>
    %c2_112 = arith.constant 2 : index
    %c2_113 = arith.constant 2 : index
    %c0_114 = arith.constant 0 : index
    %88 = vector.load %arg8[%c2_112, %c2_113, %c0_114] : memref<10x16x8xbf16, #tpu.memory_space<vmem>>, vector<8x8x8xbf16>
    %89 = tpu.concatenate %86, %87, %88 in 2 : vector<8x8x8xbf16>, vector<8x8x8xbf16>, vector<8x8x8xbf16> -> vector<8x8x24xbf16>
    %90 = vector.shape_cast %89 : vector<8x8x24xbf16> to vector<64x24xbf16>
    %c2_115 = arith.constant 2 : index
    %c0_116 = arith.constant 0 : index
    %c0_117 = arith.constant 0 : index
    %91 = vector.load %arg4[%c2_115, %c0_116, %c0_117] : memref<3x24x8xbf16, #tpu.memory_space<vmem>>, vector<1x24x8xbf16>
    %92 = vector.shape_cast %91 : vector<1x24x8xbf16> to vector<24x8xbf16>
    %cst_118 = arith.constant dense<0.000000e+00> : vector<64x8xf32>
    %93 = tpu.matmul %90, %92, %cst_118 {dimension_numbers = #tpu.dot_dimension_numbers<[1], [0], [0], [1], [0, 0, 1, 1], [], []>} : vector<64x24xbf16>, vector<24x8xbf16>, vector<64x8xf32> -> vector<64x8xf32>
    %94 = arith.addf %85, %93 : vector<64x8xf32>
    %c0_119 = arith.constant 0 : index
    %c0_120 = arith.constant 0 : index
    %95 = vector.load %arg5[%c0_119, %c0_120] : memref<1x8xf32, #tpu.memory_space<vmem>>, vector<1x8xf32>
    %96 = vector.broadcast %95 : vector<1x8xf32> to vector<64x8xf32>
    %97 = arith.addf %94, %96 : vector<64x8xf32>
    %cst_121 = arith.constant 0.000000e+00 : f32
    %98 = vector.broadcast %cst_121 : f32 to vector<64x8xf32>
    %99 = arith.maximumf %97, %98 : vector<64x8xf32>
    %100 = tpu.transpose %99, [1, 0] : vector<64x8xf32> -> vector<8x64xf32>
    %c0_122 = arith.constant 0 : index
    %c0_123 = arith.constant 0 : index
    %c0_124 = arith.constant 0 : index
    %101 = vector.load %arg6[%c0_122, %c0_123, %c0_124] : memref<1x8x64xf32, #tpu.memory_space<vmem>>, vector<1x8x64xf32>
    %102 = vector.shape_cast %101 : vector<1x8x64xf32> to vector<8x64xf32>
    %103 = vector.shape_cast %100 : vector<8x64xf32> to vector<1x8x64xf32>
    tpu.vector_store %arg6[%c0_122, %c0_123, %c0_124], %103 {strides = array<i32>} : memref<1x8x64xf32, #tpu.memory_space<vmem>>, vector<1x8x64xf32>,
    return
  }
  func.func @transform_0(%arg0: i32) -> (i32, i32, i32, i32, i32) {
    %c0_i32 = arith.constant 0 : i32
    %c0_i32_0 = arith.constant 0 : i32
    %c0_i32_1 = arith.constant 0 : i32
    %c0_i32_2 = arith.constant 0 : i32
    %c0_i32_3 = arith.constant 0 : i32
    return %arg0, %c0_i32, %c0_i32_0, %c0_i32_1, %c0_i32_2 : i32, i32, i32, i32, i32
  }
  func.func @transform_1(%arg0: i32) -> (i32, i32, i32) {
    %c0_i32 = arith.constant 0 : i32
    %c0_i32_0 = arith.constant 0 : i32
    %c0_i32_1 = arith.constant 0 : i32
    %c0_i32_2 = arith.constant 0 : i32
    return %c0_i32, %c0_i32_0, %c0_i32_1 : i32, i32, i32
  }
  func.func @transform_2(%arg0: i32) -> (i32, i32) {
    %c0_i32 = arith.constant 0 : i32
    %c0_i32_0 = arith.constant 0 : i32
    %c0_i32_1 = arith.constant 0 : i32
    return %c0_i32, %c0_i32_0 : i32, i32
  }
  func.func @transform_3(%arg0: i32) -> (i32, i32, i32) {
    %c0_i32 = arith.constant 0 : i32
    %c0_i32_0 = arith.constant 0 : i32
    %c0_i32_1 = arith.constant 0 : i32
    %c0_i32_2 = arith.constant 0 : i32
    return %c0_i32, %c0_i32_0, %c0_i32_1 : i32, i32, i32
  }
  func.func @transform_4(%arg0: i32) -> (i32, i32) {
    %c0_i32 = arith.constant 0 : i32
    %c0_i32_0 = arith.constant 0 : i32
    %c0_i32_1 = arith.constant 0 : i32
    return %c0_i32, %c0_i32_0 : i32, i32
  }
  func.func @transform_5(%arg0: i32) -> (i32, i32, i32) {
    %c0_i32 = arith.constant 0 : i32
    %c0_i32_0 = arith.constant 0 : i32
    %c0_i32_1 = arith.constant 0 : i32
    return %arg0, %c0_i32, %c0_i32_0 : i32, i32, i32
  }
}

</mosaic_0001>

<bundles_post_ra>
// kernel: down_forward.1
= control target key start
LH: loop header
LB: loop body
LE: loop exit
PB: predicated region body
PF: predicated region fallthrough
CT: control target
= control target key end

     0   :  { %s2874_s18 = smov 0   ;;  %s3755_s0 = inlined_call_operand.vmem [shape: bf16[2,8,2,8,8], index: 0, kind: input, shape index: {}]   ;;  %s3756_s1 = inlined_call_operand.vmem [shape: bf16[3,12,8], index: 1, kind: input, shape index: {}]   ;;  %s3757_s2 = inlined_call_operand.vmem [shape: f32[1,8], index: 2, kind: input, shape index: {}]   ;;  %s3758_s3 = inlined_call_operand.vmem [shape: bf16[3,24,8], index: 3, kind: input, shape index: {}]   ;;  %s3759_s4 = inlined_call_operand.vmem [shape: f32[1,8], index: 4, kind: input, shape index: {}]   ;;  %s3760_s5 = inlined_call_operand.vmem [shape: f32[2,8,64], index: 5, kind: output, shape index: {}]  }
   0x1 LB: > { %s2677_s19 = sadd.s32 4294967295, %s2837_s18   ;;  %p2681_p0 = scmp.ge.s32.totalorder %s2837_s18, 1  ;;  %s2837_s18 = sphi %s2874_s18, %s15_s18  }
   0x2   : > { %p187_p1 = scmp.lt.s32.totalorder %s2837_s18, 3 }
   0x4   : > { %p188_p2 = pnand %p2681_p0, %p187_p1 }
   0x5   : > { %p214_p3 = scmp.lt.s32.totalorder (!%p188_p2), %s2677_s19, 1  ;;  %s2839_s24 = smov (!%p188_p2), 124  }
   0x6   : > { %191 = sbr.rel (%p188_p2) target bundleno = 1012 (0x3f4), region = 40  ;;  %s2841_s25 = smov (!%p188_p2), 4  }
   0x7   : > { %s2842_s26 = smov (!%p188_p2), 8   ;;  %s2843_s16 = smov (!%p188_p2), 16  }
   0xb   : > { %vm328_vm0 = vcmask 27648   ;;  %vm334_vm1 = vcmask 24576   ;;  %vm335_vm2 = vsmask.f32 256  ;;  %v352_v1 = vld [vmem:[#allocation2 + $0x28] sm:$0x1] }
   0xc   : > { %vm2883_vm3 = vmand %vm334_vm1, %vm335_vm2  ;;  %v355_v2 = vld [vmem:[#allocation2 + $0x30] sm:$0x1]  ;;  %vm368_vm4 = vsmask.f32 7938  ;;  %s3770_s19 = smov (!%p214_p3, %s2677_s19), 1  ;;  %v2840_v46 = vmov 0  }
   0xd   : > { %v353_v3 = vsel %vm2883_vm3, 0, %v352_v1  ;;  %v356_v4 = vsel %vm2883_vm3, 0, %v355_v2  ;;  %vm2895_vm5 = vmand %vm328_vm0, %vm368_vm4  ;;  %v385_v6 = vld [vmem:[#allocation2 + $0x2c] sm:$0xf]  ;;  %v388_v8 = vld [vmem:[#allocation2 + $0x34] sm:$0xf] }
   0xe   : > { %354 = vst [vmem:[#allocation2 + $0x28] sm:$0x1] %v353_v3  ;;  %v386_v7 = vsel %vm2895_vm5, 0, %v385_v6  ;;  %s2745_s20 = sshll.u32 %s3770_s19, 6  ;;  %v389_v9 = vsel %vm2895_vm5, 0, %v388_v8  ;;  %vm1022_vm6 = vcmask 1045504  }
   0xf   : > { %357 = vst [vmem:[#allocation2 + $0x30] sm:$0x1] %v356_v4  ;;  %s218_s23 = scalar_lea.vmem %s3755_s0, %s2745_s20  ;;  %v343_v51 = vld [vmem:[#allocation2 + $0x10] sm:$0x1]  ;;  %v346_v52 = vld [vmem:[#allocation2 + $0x18] sm:$0x1] }
  0x10   : > { %387 = vst [vmem:[#allocation2 + $0x2c] sm:$0xf] %v386_v7  ;;  %v2787_v10 = vld [vmem:[%s218_s23 + $0x20] sm:$0xff]   ;;  %v2788_v11 = vld [vmem:[%s218_s23 + $0x28] sm:$0xff]   ;;  %v2785_v17 = vld [vmem:[%s218_s23 + $0x10] sm:$0xff]   ;;  %v344_v54 = vsel %vm2883_vm3, 0, %v343_v51 }
  0x11   : > { %v2784_v12 = vld [vmem:[%s218_s23 + $0x8] sm:$0xff]   ;;  %390 = vst [vmem:[#allocation2 + $0x34] sm:$0xf] %v389_v9  ;;  %v2770_v13 = vunpack.c.l.bf16 %v2787_v10  ;;  %v2771_v14 = vunpack.c.h.bf16 %v2787_v10  ;;  %v2774_v15 = vunpack.c.l.bf16 %v2788_v11  ;;  %v2775_v16 = vunpack.c.h.bf16 %v2788_v11  ;;  %v2789_v18 = vld [vmem:[%s218_s23 + $0x30] sm:$0xff]   ;;  %v2790_v19 = vld [vmem:[%s218_s23 + $0x38] sm:$0xff]   ;;  %s2684_s8 = sshll.u32 %s3770_s19, 3 }
  0x12   : > { %v2758_v20 = vunpack.c.l.bf16 %v2784_v12  ;;  %v2759_v21 = vunpack.c.h.bf16 %v2784_v12  ;;  %v2762_v22 = vunpack.c.l.bf16 %v2785_v17  ;;  %v2763_v23 = vunpack.c.h.bf16 %v2785_v17  ;;  %v2753_v24 = vld [vmem:[%s218_s23] sm:$0xff]   ;;  %v2786_v33 = vld [vmem:[%s218_s23 + $0x18] sm:$0xff]   ;;  %329 = vst.msk [vmem:[#allocation2] sm:$0xf] %vm328_vm0, %v2840_v46  ;;  %v376_v53 = vld [vmem:[#allocation2 + $0x14] sm:$0xf]  ;;  %s222_s11 = scalar_lea.vmem %s3760_s5, %s2684_s8 }
  0x13   : > { %v2907_v25 = vmax.f32 %v2770_v13, %v2771_v14  ;;  %v2909_v26 = vmax.f32 %v2774_v15, %v2775_v16  ;;  %v2778_v27 = vunpack.c.l.bf16 %v2789_v18  ;;  %v2779_v28 = vunpack.c.h.bf16 %v2789_v18  ;;  %330 = vst.msk [vmem:[#allocation2 + $0x4] sm:$0xf] %vm328_vm0, %v2840_v46  ;;  %v379_v57 = vld [vmem:[#allocation2 + $0x1c] sm:$0xf]  ;;  %v358_v59 = vld [vmem:[#allocation2 + $0x38] sm:$0x1] }
  0x14   : > { %v2911_v29 = vmax.f32 %v2758_v20, %v2759_v21  ;;  %v2913_v30 = vmax.f32 %v2762_v22, %v2763_v23  ;;  %v2782_v31 = vunpack.c.l.bf16 %v2790_v19  ;;  %v2783_v32 = vunpack.c.h.bf16 %v2790_v19  ;;  %332 = vst.msk [vmem:[#allocation2 + $0x48] sm:$0xf] %vm328_vm0, %v2840_v46  ;;  %v361_v60 = vld [vmem:[#allocation2 + $0x40] sm:$0x1]  ;;  %v391_v63 = vld [vmem:[#allocation2 + $0x3c] sm:$0xf] }
  0x15   : > { %v2915_v34 = vmax.f32 %v2778_v27, %v2779_v28  ;;  %v2754_v35 = vunpack.c.l.bf16 %v2753_v24  ;;  %v2755_v37 = vunpack.c.h.bf16 %v2753_v24  ;;  %v2766_v38 = vunpack.c.l.bf16 %v2786_v33  ;;  %333 = vst.msk [vmem:[#allocation2 + $0x4c] sm:$0xf] %vm328_vm0, %v2840_v46  ;;  %v394_v2 = vld [vmem:[#allocation2 + $0x44] sm:$0xf]  ;;  %v340_v9 = vld [vmem:[#allocation2 + $0x8] sm:$0x1] }
  0x16   : > { %v2917_v36 = vmax.f32 %v2782_v31, %v2783_v32  ;;  %v2767_v39 = vunpack.c.h.bf16 %v2786_v33  ;;  %v2807_v40 = vpack.i.bf16 %v2909_v26, %v2907_v25  ;;  %v2817_v42 = vpack.i.bf16 %v2913_v30, %v2911_v29  ;;  %345 = vst [vmem:[#allocation2 + $0x10] sm:$0x1] %v344_v54  ;;  %v349_v10 = vld [vmem:[#allocation2 + $0x20] sm:$0x1]  ;;  %v373_v14 = vld [vmem:[#allocation2 + $0xc] sm:$0xf] }
  0x17   : > { %v2921_v41 = vmax.f32 %v2754_v35, %v2755_v37  ;;  %v347_v55 = vsel %vm2883_vm3, 0, %v346_v52  ;;  %v377_v56 = vsel %vm2895_vm5, 0, %v376_v53  ;;  %v380_v58 = vsel %vm2895_vm5, 0, %v379_v57  ;;  %v382_v16 = vld [vmem:[#allocation2 + $0x24] sm:$0xf] }
  0x18   : > { %v2925_v43 = vmax.f32 %v2766_v38, %v2767_v39  ;;  %2808 = vrot.lane.b32.xlu0 %v2807_v40, %s2839_s24  ;;  %2818 = vrot.lane.b32.xlu1 %v2817_v42, %s2839_s24  ;;  %v2812_v44 = vpack.i.bf16 %v2917_v36, %v2915_v34  ;;  %348 = vst [vmem:[#allocation2 + $0x18] sm:$0x1] %v347_v55  ;;  %v359_v61 = vsel %vm2883_vm3, 0, %v358_v59  ;;  %v362_v62 = vsel %vm2883_vm3, 0, %v361_v60 }
  0x19   : > { %v337_v47 = vld [vmem:[#allocation2] sm:$0x1]  ;;  %378 = vst [vmem:[#allocation2 + $0x14] sm:$0xf] %v377_v56  ;;  %v392_v1 = vsel %vm2895_vm5, 0, %v391_v63  ;;  %v395_v3 = vsel %vm2895_vm5, 0, %v394_v2 }
  0x1a   : > { %v2822_v45 = vpack.i.bf16 %v2925_v43, %v2921_v41  ;;  %v338_v48 = vsel %vm2883_vm3, 0, %v337_v47  ;;  %v370_v49 = vld [vmem:[#allocation2 + $0x4] sm:$0xf]  ;;  %381 = vst [vmem:[#allocation2 + $0x1c] sm:$0xf] %v380_v58  ;;  %v341_v12 = vsel %vm2883_vm3, 0, %v340_v9 }
  0x1b   : > { %339 = vst [vmem:[#allocation2] sm:$0x1] %v338_v48  ;;  %v371_v50 = vsel %vm2895_vm5, 0, %v370_v49  ;;  %v350_v13 = vsel %vm2883_vm3, 0, %v349_v10  ;;  %v374_v15 = vsel %vm2895_vm5, 0, %v373_v14  ;;  %v383_v17 = vsel %vm2895_vm5, 0, %v382_v16 }
  0x1c   : > { %372 = vst [vmem:[#allocation2 + $0x4] sm:$0xf] %v371_v50  ;;  %v545_v21 = vld [vmem:[#allocation2] sm:$0xe]  ;;  %v505_v56 = vld [vmem:[#allocation2 + $0x28] sm:$0xf] }
  0x1d   : > { %360 = vst [vmem:[#allocation2 + $0x38] sm:$0x1] %v359_v61  ;;  %v673_v22 = vunpack.c.l.b16 %v545_v21  ;;  %v514_v61 = vld [vmem:[#allocation2 + $0x34] sm:$0x1]  ;;  %v487_v16 = vld [vmem:[#allocation2 + $0x10] sm:$0xf] }
  0x1e   : > { %363 = vst [vmem:[#allocation2 + $0x40] sm:$0x1] %v362_v62  ;;  %vm713_vm7 = vcmask 31744   ;;  %vm738_vm8 = vcmask 64512   ;;  %vm1009_vm9 = vcmask 97280   ;;  %vm1449_vm10 = vcmask 60416  }
  0x1f   : > { %393 = vst [vmem:[#allocation2 + $0x3c] sm:$0xf] %v392_v1  ;;  %v493_v9 = vld [vmem:[#allocation2 + $0x18] sm:$0xf]  ;;  %vm1455_vm11 = vcmask 57344   ;;  %vm3398_vm13 = vmand %vm1449_vm10, %vm368_vm4  ;;  %vm2154_vm14 = vcmask 1043456  }
  0x20   : > { %2813 = vrot.lane.b32.xlu0 %v2812_v44, %s2839_s24  ;;  %2823 = vrot.lane.b32.xlu1 %v2822_v45, %s2839_s24  ;;  %396 = vst [vmem:[#allocation2 + $0x44] sm:$0xf] %v395_v3  ;;  %v508_v3 = vld [vmem:[#allocation2 + $0x2c] sm:$0x1]  ;;  %v490_v21 = vld [vmem:[#allocation2 + $0x14] sm:$0x1]  ;;  %vm3390_vm12 = vmand %vm1455_vm11, %vm335_vm2 }
  0x21   : > { %342 = vst [vmem:[#allocation2 + $0x8] sm:$0x1] %v341_v12  ;;  %vm1864_vm15 = vcmask 130048   ;;  %vm2141_vm0 = vcmask 195584   ;;  %vm2622_vm1 = vcmask 523264  }
  0x22   : > { %v529_v4 = vld [vmem:[#allocation2] sm:$0xf]  ;;  %351 = vst [vmem:[#allocation2 + $0x20] sm:$0x1] %v350_v13 }
  0x23   : > { %v537_v6 = vld [vmem:[#allocation2 + $0x4] sm:$0x1]  ;;  %v569_v7 = vunpack.c.l.b16 %v529_v4  ;;  %375 = vst [vmem:[#allocation2 + $0xc] sm:$0xf] %v374_v15 }
  0x24   : > { %v570_v8 = vunpack.c.l.b16 %v537_v6  ;;  %384 = vst [vmem:[#allocation2 + $0x24] sm:$0xf] %v383_v17  ;;  %v496_v17 = vld [vmem:[#allocation2 + $0x1c] sm:$0x1] }
  0x25   : > { %1450 = vst.msk [vmem:[#allocation3] sm:$0xf] %vm1449_vm10, %v2840_v46 }
  0x26   : > { %v585_v11 = vpack.c.b16 %v570_v8, %v569_v7  ;;  %v681_v24 = vpack.c.b16 %v570_v8, %v673_v22  ;;  %1451 = vst.msk [vmem:[#allocation3 + $0x4] sm:$0xf] %vm1449_vm10, %v2840_v46 }
  0x27   : > { %1453 = vst.msk [vmem:[#allocation3 + $0x48] sm:$0xf] %vm1449_vm10, %v2840_v46 }
  0x28   : > { %v594_v18 = vshrl.u32 %v585_v11, 16  ;;  %v596_v19 = vshll.u32 %v585_v11, 16  ;;  %v689_v33 = vrot.slane %v681_v24, 1  ;;  %1454 = vst.msk [vmem:[#allocation3 + $0x4c] sm:$0xf] %vm1449_vm10, %v2840_v46 }
  0x2a   : > { %v598_v20 = vrot.slane %v596_v19, 1  ;;  %697 = vrot.lane.b32.xlu2 %v689_v33, %s2842_s26 }
  0x2c   : > { %v599_v23 = vor.u32 %v598_v20, %v594_v18 }
  0x2e   : > { %649 = vrot.lane.b32.xlu1 %v599_v23, %s2841_s25 }
  0x84   : > { %v3214_v0 = vpop.permute.xlu2 %697 }
  0x8a   : > { %v2809_v27 = vpop.permute.xlu0 %2808  ;;  %v2819_v32 = vpop.permute.xlu1 %2818 }
  0x8b   : > { %v2811_v28 = vunpack.i.h.bf16 %v2809_v27  ;;  %v2810_v31 = vunpack.i.l.bf16 %v2809_v27  ;;  %v2821_v35 = vunpack.i.h.bf16 %v2819_v32  ;;  %v2820_v37 = vunpack.i.l.bf16 %v2819_v32 }
  0x8d   : > { %v317_v38 = vmax.f32 %v2909_v26, %v2811_v28  ;;  %v316_v39 = vmax.f32 %v2907_v25, %v2810_v31  ;;  %v314_v40 = vmax.f32 %v2913_v30, %v2821_v35  ;;  %v313_v42 = vmax.f32 %v2911_v29, %v2820_v37  ;;  %v511_v29 = vld [vmem:[#allocation2 + $0x30] sm:$0xf] }
  0x8f   : > { %v325_v44 = vpack.c.bf16 %v317_v38, %v317_v38  ;;  %v324_v45 = vpack.c.bf16 %v316_v39, %v316_v39  ;;  %v322_v47 = vpack.c.bf16 %v314_v40, %v314_v40  ;;  %v321_v48 = vpack.c.bf16 %v313_v42, %v313_v42  ;;  %v517_v39 = vld [vmem:[#allocation2 + $0x38] sm:$0xf]  ;;  %v523_v40 = vld [vmem:[#allocation2 + $0x40] sm:$0xf] }
  0x91   : > { %v441_v49 = vshrl.u32 %v325_v44, 16  ;;  %v444_v50 = vshll.u32 %v325_v44, 16  ;;  %v433_v51 = vshrl.u32 %v324_v45, 16  ;;  %v436_v52 = vshll.u32 %v324_v45, 16 }
  0x92   : > { %v417_v53 = vshrl.u32 %v322_v47, 16  ;;  %v420_v54 = vshll.u32 %v322_v47, 16  ;;  %v409_v26 = vshrl.u32 %v321_v48, 16  ;;  %v412_v55 = vshll.u32 %v321_v48, 16  ;;  %v2814_v25 = vpop.permute.xlu0 %2813  ;;  %v2824_v60 = vpop.permute.xlu1 %2823 }
  0x93   : > { %v443_v57 = vrot.slane %v441_v49, 7  ;;  %v435_v58 = vrot.slane %v433_v51, 7  ;;  %v2816_v59 = vunpack.i.h.bf16 %v2814_v25  ;;  %v2815_v30 = vunpack.i.l.bf16 %v2814_v25  ;;  %v520_v51 = vld [vmem:[#allocation2 + $0x3c] sm:$0x1] }
  0x94   : > { %v419_v62 = vrot.slane %v417_v53, 7  ;;  %v411_v63 = vrot.slane %v409_v26, 7  ;;  %v2826_v1 = vunpack.i.h.bf16 %v2824_v60  ;;  %v2825_v2 = vunpack.i.l.bf16 %v2824_v60 }
  0x95   : > { %v446_v4 = vor.u32 %v444_v50, %v443_v57  ;;  %v447_v6 = vrot.slane %v443_v57, 4  ;;  %v438_v7 = vor.u32 %v436_v52, %v435_v58  ;;  %v439_v8 = vrot.slane %v435_v58, 4  ;;  %v526_v52 = vld [vmem:[#allocation2 + $0x44] sm:$0x1]  ;;  %v499_v57 = vld [vmem:[#allocation2 + $0x20] sm:$0xf] }
  0x96   : > { %v422_v10 = vor.u32 %v420_v54, %v419_v62  ;;  %v423_v11 = vrot.slane %v419_v62, 4  ;;  %v414_v12 = vor.u32 %v412_v55, %v411_v63  ;;  %v415_v20 = vrot.slane %v411_v63, 4 }
  0x97   : > { %v512_v13 = vsel %vm2895_vm5, %v446_v4, %v511_v29  ;;  %v515_v14 = vsel %vm2883_vm3, %v447_v6, %v514_v61  ;;  %v506_v15 = vsel %vm2895_vm5, %v438_v7, %v505_v56  ;;  %v509_v18 = vsel %vm2883_vm3, %v439_v8, %v508_v3  ;;  %v481_v6 = vld [vmem:[#allocation2 + $0x8] sm:$0xf]  ;;  %v484_v8 = vld [vmem:[#allocation2 + $0xc] sm:$0x1] }
  0x98   : > { %513 = vst [vmem:[#allocation2 + $0x30] sm:$0xf] %v512_v13  ;;  %v494_v19 = vsel %vm2895_vm5, %v422_v10, %v493_v9  ;;  %v319_v22 = vmax.f32 %v2917_v36, %v2816_v59  ;;  %v318_v23 = vmax.f32 %v2915_v34, %v2815_v30  ;;  %v315_v24 = vmax.f32 %v2925_v43, %v2826_v1 }
  0x99   : > { %516 = vst [vmem:[#allocation2 + $0x34] sm:$0x1] %v515_v14  ;;  %v312_v27 = vmax.f32 %v2921_v41, %v2825_v2  ;;  %v497_v28 = vsel %vm2883_vm3, %v423_v11, %v496_v17  ;;  %v488_v31 = vsel %vm2895_vm5, %v414_v12, %v487_v16  ;;  %v491_v34 = vsel %vm2883_vm3, %v415_v20, %v490_v21  ;;  %v502_v2 = vld [vmem:[#allocation2 + $0x24] sm:$0x1] }
  0x9a   : > { %507 = vst [vmem:[#allocation2 + $0x28] sm:$0xf] %v506_v15  ;;  %v327_v32 = vpack.c.bf16 %v319_v22, %v319_v22  ;;  %v326_v33 = vpack.c.bf16 %v318_v23, %v318_v23  ;;  %v323_v35 = vpack.c.bf16 %v315_v24, %v315_v24 }
  0x9b   : > { %510 = vst [vmem:[#allocation2 + $0x2c] sm:$0x1] %v509_v18  ;;  %v320_v37 = vpack.c.bf16 %v312_v27, %v312_v27 }
  0x9c   : > { %495 = vst [vmem:[#allocation2 + $0x18] sm:$0xf] %v494_v19  ;;  %v457_v36 = vshrl.u32 %v327_v32, 16  ;;  %v460_v43 = vshll.u32 %v327_v32, 16  ;;  %v449_v41 = vshrl.u32 %v326_v33, 16  ;;  %v452_v38 = vshll.u32 %v326_v33, 16 }
  0x9d   : > { %498 = vst [vmem:[#allocation2 + $0x1c] sm:$0x1] %v497_v28  ;;  %v425_v42 = vshrl.u32 %v323_v35, 16  ;;  %v428_v44 = vshll.u32 %v323_v35, 16  ;;  %v401_v45 = vshrl.u32 %v320_v37, 16  ;;  %v404_v47 = vshll.u32 %v320_v37, 16 }
  0x9e   : > { %489 = vst [vmem:[#allocation2 + $0x10] sm:$0xf] %v488_v31  ;;  %v459_v48 = vrot.slane %v457_v36, 7  ;;  %v451_v49 = vrot.slane %v449_v41, 7 }
  0x9f   : > { %492 = vst [vmem:[#allocation2 + $0x14] sm:$0x1] %v491_v34  ;;  %v778_v50 = vld [vmem:[#allocation2 + $0x30] sm:$0xe]  ;;  %v427_v53 = vrot.slane %v425_v42, 7  ;;  %v403_v54 = vrot.slane %v401_v45, 7 }
  0xa0   : > { %v462_v26 = vor.u32 %v460_v43, %v459_v48  ;;  %v463_v55 = vrot.slane %v459_v48, 4  ;;  %v454_v25 = vor.u32 %v452_v38, %v451_v49  ;;  %v455_v56 = vrot.slane %v451_v49, 4  ;;  %v2993_v58 = vld [vmem:[#allocation2 + $0x34] sm:$0x1] }
  0xa1   : > { %v430_v59 = vor.u32 %v428_v44, %v427_v53  ;;  %v431_v30 = vrot.slane %v427_v53, 4  ;;  %v777_v29 = vld [vmem:[#allocation2 + $0x28] sm:$0xe]  ;;  %v906_v61 = vunpack.c.l.b16 %v778_v50  ;;  %v406_v3 = vor.u32 %v404_v47, %v403_v54 }
  0xa2   : > { %v2995_v60 = vld [vmem:[#allocation2 + $0x2c] sm:$0x1]  ;;  %v524_v62 = vsel %vm2895_vm5, %v462_v26, %v523_v40  ;;  %v527_v63 = vsel %vm2883_vm3, %v463_v55, %v526_v52  ;;  %v518_v1 = vsel %vm2895_vm5, %v454_v25, %v517_v39  ;;  %v521_v4 = vsel %vm2883_vm3, %v455_v56, %v520_v51  ;;  %v3050_v56 = vld [vmem:[#allocation2 + $0x28] sm:$0xf] }
  0xa3   : > { %525 = vst [vmem:[#allocation2 + $0x40] sm:$0xf] %v524_v62  ;;  %v407_v7 = vrot.slane %v403_v54, 4  ;;  %v500_v9 = vsel %vm2895_vm5, %v430_v59, %v499_v57  ;;  %v806_v10 = vunpack.c.l.b16 %v2995_v60  ;;  %v905_v11 = vunpack.c.l.b16 %v777_v29  ;;  %v1142_v14 = vld [vmem:[#allocation2 + $0x18] sm:$0xe] }
  0xa4   : > { %528 = vst [vmem:[#allocation2 + $0x44] sm:$0x1] %v527_v63  ;;  %v808_v12 = vunpack.c.l.b16 %v2993_v58  ;;  %v503_v13 = vsel %vm2883_vm3, %v431_v30, %v502_v2  ;;  %v482_v15 = vsel %vm2895_vm5, %v406_v3, %v481_v6  ;;  %v3019_v19 = vld [vmem:[#allocation2 + $0x1c] sm:$0x1]  ;;  %v1270_v22 = vunpack.c.l.b16 %v1142_v14  ;;  %v3052_v57 = vld [vmem:[#allocation2 + $0x2c] sm:$0x1] }
  0xa5   : > { %519 = vst [vmem:[#allocation2 + $0x38] sm:$0xf] %v518_v1  ;;  %v913_v16 = vpack.c.b16 %v806_v10, %v905_v11  ;;  %v485_v18 = vsel %vm2883_vm3, %v407_v7, %v484_v8  ;;  %v1168_v24 = vunpack.c.l.b16 %v3019_v19  ;;  %v1141_v34 = vld [vmem:[#allocation2 + $0x10] sm:$0xe]  ;;  %v1144_v59 = vld [vmem:[#allocation2 + $0x28] sm:$0xe]  ;;  %v805_v63 = vunpack.c.l.b16 %v3050_v56 }
  0xa6   : > { %522 = vst [vmem:[#allocation2 + $0x3c] sm:$0x1] %v521_v4  ;;  %v914_v17 = vpack.c.b16 %v808_v12, %v906_v61  ;;  %v3032_v41 = vld [vmem:[#allocation2 + $0x14] sm:$0x1]  ;;  %v1269_v42 = vunpack.c.l.b16 %v1141_v34  ;;  %v774_v25 = vld [vmem:[#allocation2 + $0x10] sm:$0xe]  ;;  %v1172_v4 = vunpack.c.l.b16 %v3052_v57  ;;  %v1272_v6 = vunpack.c.l.b16 %v1144_v59 }
  0xa7   : > { %501 = vst [vmem:[#allocation2 + $0x20] sm:$0xf] %v500_v9  ;;  %v921_v20 = vrot.slane %v913_v16, 1  ;;  %v1278_v32 = vpack.c.b16 %v1168_v24, %v1270_v22  ;;  %v1166_v51 = vunpack.c.l.b16 %v3032_v41  ;;  %v3056_v29 = vld [vmem:[#allocation2 + $0x14] sm:$0x1]  ;;  %v902_v61 = vunpack.c.l.b16 %v774_v25 }
  0xa8   : > { %504 = vst [vmem:[#allocation2 + $0x24] sm:$0x1] %v503_v13  ;;  %v922_v21 = vrot.slane %v914_v17, 1  ;;  %v775_v62 = vld [vmem:[#allocation2 + $0x18] sm:$0xe]  ;;  %v800_v7 = vunpack.c.l.b16 %v3056_v29  ;;  %v1280_v17 = vpack.c.b16 %v1172_v4, %v1272_v6 }
  0xa9   : > { %483 = vst [vmem:[#allocation2 + $0x8] sm:$0xf] %v482_v15  ;;  %933 = vrot.lane.b32.xlu0 %v921_v20, %s2842_s26  ;;  %v1286_v39 = vrot.slane %v1278_v32, 1  ;;  %v1277_v54 = vpack.c.b16 %v1166_v51, %v1269_v42  ;;  %v3059_v1 = vld [vmem:[#allocation2 + $0x18] sm:$0xf]  ;;  %v903_v11 = vunpack.c.l.b16 %v775_v62  ;;  %v817_v15 = vpack.c.b16 %v806_v10, %v805_v63 }
  0xaa   : > { %486 = vst [vmem:[#allocation2 + $0xc] sm:$0x1] %v485_v18  ;;  %935 = vrot.lane.b32.xlu1 %v922_v21, %s2842_s26  ;;  %v780_v23 = vld [vmem:[#allocation2 + $0x40] sm:$0xe]  ;;  %v3063_v8 = vld [vmem:[#allocation2 + $0x1c] sm:$0x1]  ;;  %v1167_v13 = vunpack.c.l.b16 %v3059_v1  ;;  %v910_v14 = vpack.c.b16 %v800_v7, %v902_v61 }
  0xab   : > { %v3024_v27 = vld [vmem:[#allocation2 + $0x44] sm:$0x1]  ;;  %v908_v28 = vunpack.c.l.b16 %v780_v23  ;;  %v1285_v2 = vrot.slane %v1277_v54, 1  ;;  %v802_v16 = vunpack.c.l.b16 %v3063_v8  ;;  %v548_v18 = vld [vmem:[#allocation2 + $0x18] sm:$0xe]  ;;  %v1288_v10 = vrot.slane %v1280_v17, 1 }
  0xac   : > { %v812_v31 = vunpack.c.l.b16 %v3024_v27  ;;  %v779_v33 = vld [vmem:[#allocation2 + $0x38] sm:$0xe]  ;;  %v3074_v19 = vld [vmem:[#allocation2 + $0x30] sm:$0xf]  ;;  %v3076_v20 = vld [vmem:[#allocation2 + $0x40] sm:$0xf]  ;;  %v1182_v22 = vpack.c.b16 %v1168_v24, %v1167_v13  ;;  %v676_v32 = vunpack.c.l.b16 %v548_v18 }
  0xad   : > { %v3027_v35 = vld [vmem:[#allocation2 + $0x3c] sm:$0x1]  ;;  %v907_v37 = vunpack.c.l.b16 %v779_v33  ;;  %v911_v21 = vpack.c.b16 %v802_v16, %v903_v11  ;;  %v918_v23 = vrot.slane %v910_v14, 1  ;;  %v807_v33 = vunpack.c.l.b16 %v3074_v19  ;;  %v1146_v54 = vld [vmem:[#allocation2 + $0x38] sm:$0xe] }
  0xae   : > { %v916_v36 = vpack.c.b16 %v812_v31, %v908_v28  ;;  %v810_v43 = vunpack.c.l.b16 %v3027_v35  ;;  %v852_v28 = vshll.u32 %v817_v15, 16  ;;  %v3080_v60 = vld [vmem:[#allocation2 + $0x1c] sm:$0x1]  ;;  %v1274_v27 = vunpack.c.l.b16 %v1146_v54  ;;  %v3114_v18 = vld [vmem:[#allocation2 + $0x28] sm:$0xf] }
  0xaf   : > { %v919_v34 = vrot.slane %v911_v21, 1 }
  0xb0   : > { %v924_v38 = vrot.slane %v916_v36, 1  ;;  %v915_v40 = vpack.c.b16 %v810_v43, %v907_v37  ;;  %v773_v44 = vld [vmem:[#allocation2 + $0x8] sm:$0xe]  ;;  %v811_v37 = vunpack.c.l.b16 %v3076_v20  ;;  %v1199_v36 = vshll.u32 %v1182_v22, 16 }
  0xb1   : > { %v546_v45 = vld [vmem:[#allocation2 + $0x8] sm:$0xe]  ;;  %v3036_v47 = vld [vmem:[#allocation2 + $0xc] sm:$0x1]  ;;  %1295 = vrot.lane.b32.xlu0 %v1286_v39, %s2842_s26  ;;  %v901_v52 = vunpack.c.l.b16 %v773_v44  ;;  %v854_v39 = vrot.slane %v852_v28, 1  ;;  %v850_v44 = vshrl.u32 %v817_v15, 16 }
  0xb2   : > { %v3038_v48 = vld [vmem:[#allocation2 + $0xc] sm:$0x1]  ;;  %v674_v49 = vunpack.c.l.b16 %v546_v45  ;;  %939 = vrot.lane.b32.xlu2 %v924_v38, %s2842_s26  ;;  %v923_v50 = vrot.slane %v915_v40, 1  ;;  %v798_v26 = vunpack.c.l.b16 %v3036_v47  ;;  %v576_v38 = vunpack.c.l.b16 %v3080_v60  ;;  %v3094_v45 = vld [vmem:[#allocation2 + $0x10] sm:$0xf] }
  0xb3   : > { %v572_v53 = vunpack.c.l.b16 %v3038_v48  ;;  %v818_v40 = vpack.c.b16 %v808_v12, %v807_v33  ;;  %v820_v42 = vpack.c.b16 %v812_v31, %v811_v37  ;;  %v1165_v58 = vunpack.c.l.b16 %v3094_v45  ;;  %v3112_v15 = vld [vmem:[#allocation2 + $0x24] sm:$0x1] }
  0xb4   : > { %937 = vrot.lane.b32.xlu1 %v923_v50, %s2842_s26  ;;  %v909_v30 = vpack.c.b16 %v798_v26, %v901_v52  ;;  %v684_v24 = vpack.c.b16 %v576_v38, %v676_v32  ;;  %v1201_v50 = vrot.slane %v1199_v36, 1  ;;  %v855_v52 = vor.u32 %v854_v39, %v850_v44  ;;  %v3126_v36 = vld [vmem:[#allocation2 + $0x2c] sm:$0x1]  ;;  %v550_v39 = vld [vmem:[#allocation2 + $0x28] sm:$0xe] }
  0xb5   : > { %v682_v55 = vpack.c.b16 %v572_v53, %v674_v49  ;;  %v1197_v49 = vshrl.u32 %v1182_v22, 16  ;;  %v859_v59 = vshll.u32 %v818_v40, 16  ;;  %v873_v29 = vshll.u32 %v820_v42, 16 }
  0xb6   : > { %v917_v9 = vrot.slane %v909_v30, 1  ;;  %v692_v25 = vrot.slane %v684_v24, 1  ;;  %v3098_v30 = vld [vmem:[#allocation2 + $0x3c] sm:$0x1]  ;;  %v871_v63 = vshrl.u32 %v820_v42, 16  ;;  %v1181_v6 = vpack.c.b16 %v1166_v51, %v1165_v58 }
  0xb7   : > { %v690_v3 = vrot.slane %v682_v55, 1  ;;  %v3096_v55 = vld [vmem:[#allocation2 + $0x10] sm:$0xf]  ;;  %v1202_v12 = vor.u32 %v1201_v50, %v1197_v49  ;;  %v1176_v61 = vunpack.c.l.b16 %v3098_v30  ;;  %v861_v62 = vrot.slane %v859_v59, 1  ;;  %v539_v50 = vld [vmem:[#allocation2 + $0x14] sm:$0x1] }
  0xb8   : > { %v799_v31 = vunpack.c.l.b16 %v3096_v55  ;;  %v857_v11 = vshrl.u32 %v818_v40, 16  ;;  %v1170_v51 = vunpack.c.l.b16 %v3112_v15  ;;  %v1190_v33 = vshrl.u32 %v1181_v6, 16 }
  0xb9   : > { %699 = vrot.lane.b32.xlu0 %v690_v3, %s2842_s26  ;;  %v1143_v3 = vld [vmem:[#allocation2 + $0x20] sm:$0xe]  ;;  %v1282_v13 = vpack.c.b16 %v1176_v61, %v1274_v27  ;;  %v580_v44 = vunpack.c.l.b16 %v3126_v36  ;;  %v678_v49 = vunpack.c.l.b16 %v550_v39  ;;  %v547_v27 = vld [vmem:[#allocation2 + $0x10] sm:$0xe] }
  0xba   : > { %1293 = vrot.lane.b32.xlu2 %v1285_v2, %s2842_s26  ;;  %v875_v2 = vrot.slane %v873_v29, 1  ;;  %v814_v14 = vpack.c.b16 %v800_v7, %v799_v31  ;;  %v1271_v17 = vunpack.c.l.b16 %v1143_v3  ;;  %v862_v21 = vor.u32 %v861_v62, %v857_v11  ;;  %v3139_v31 = vld [vmem:[#allocation2 + $0x34] sm:$0x1]  ;;  %v1145_v62 = vld [vmem:[#allocation2 + $0x30] sm:$0xe] }
  0xbb   : > { %v1290_v41 = vrot.slane %v1282_v13, 1  ;;  %v1171_v7 = vunpack.c.l.b16 %v3114_v18  ;;  %v574_v29 = vunpack.c.l.b16 %v539_v50  ;;  %v686_v57 = vpack.c.b16 %v580_v44, %v678_v49 }
  0xbc   : > { %925 = vrot.lane.b32.xlu1 %v917_v9, %s2842_s26  ;;  %v3108_v9 = vld [vmem:[#allocation2 + $0x38] sm:$0xf]  ;;  %v876_v22 = vor.u32 %v875_v2, %v871_v63  ;;  %v1279_v32 = vpack.c.b16 %v1170_v51, %v1271_v17  ;;  %v829_v24 = vshrl.u32 %v814_v14, 16  ;;  %v3141_v63 = vld [vmem:[#allocation2 + $0x8] sm:$0xf]  ;;  %v675_v13 = vunpack.c.l.b16 %v547_v27 }
  0xbd   : > { %v809_v28 = vunpack.c.l.b16 %v3108_v9  ;;  %v1184_v42 = vpack.c.b16 %v1172_v4, %v1171_v7  ;;  %v694_v11 = vrot.slane %v686_v57, 1  ;;  %v3143_v17 = vld [vmem:[#allocation2 + $0x20] sm:$0xf] }
  0xbe   : > { %v1287_v54 = vrot.slane %v1279_v32, 1  ;;  %v803_v32 = vunpack.c.l.b16 %v3143_v17 }
  0xc1   : > { %1299 = vrot.lane.b32.xlu0 %v1288_v10, %s2842_s26  ;;  %v831_v10 = vshll.u32 %v814_v14, 16  ;;  %v768_v14 = vld [vmem:[#allocation2 + $0x24] sm:$0x1] }
  0xc2   : > { %927 = vrot.lane.b32.xlu2 %v918_v23, %s2842_s26  ;;  %v1192_v23 = vshll.u32 %v1181_v6, 16  ;;  %v1211_v6 = vshrl.u32 %v1184_v42, 16  ;;  %v804_v7 = vunpack.c.l.b16 %v768_v14 }
  0xc3   : > { %v833_v40 = vrot.slane %v831_v10, 1 }
  0xc4   : > { %929 = vrot.lane.b32.xlu1 %v919_v34, %s2842_s26  ;;  %v1194_v37 = vrot.slane %v1192_v23, 1  ;;  %v819_v34 = vpack.c.b16 %v810_v43, %v809_v28  ;;  %v1213_v43 = vshll.u32 %v1184_v42, 16  ;;  %v1273_v23 = vunpack.c.l.b16 %v1145_v62 }
  0xc5   : > { %v834_v35 = vor.u32 %v833_v40, %v829_v24  ;;  %v797_v28 = vunpack.c.l.b16 %v3141_v63  ;;  %v3155_v24 = vld [vmem:[#allocation2 + $0x20] sm:$0xf]  ;;  %v3157_v40 = vld [vmem:[#allocation2 + $0x8] sm:$0xf]  ;;  %v816_v50 = vpack.c.b16 %v804_v7, %v803_v32 }
  0xc6   : > { %v866_v59 = vshll.u32 %v819_v34, 16  ;;  %v864_v4 = vshrl.u32 %v819_v34, 16  ;;  %v1215_v2 = vrot.slane %v1213_v43, 1  ;;  %v776_v34 = vld [vmem:[#allocation2 + $0x20] sm:$0xe] }
  0xc7   : > { %v813_v39 = vpack.c.b16 %v798_v26, %v797_v28  ;;  %v845_v26 = vshll.u32 %v816_v50, 16 }
  0xc9   : > { %703 = vrot.lane.b32.xlu0 %v692_v25, %s2842_s26  ;;  %v1195_v25 = vor.u32 %v1194_v37, %v1190_v33  ;;  %v683_v33 = vpack.c.b16 %v574_v29, %v675_v13  ;;  %v822_v27 = vshrl.u32 %v813_v39, 16 }
  0xca   : > { %885 = vrot.lane.b32.xlu2 %v855_v52, %s2841_s25  ;;  %v3131_v52 = vld [vmem:[#allocation2 + $0x10] sm:$0xf] }
  0xcb   : > { %v573_v58 = vunpack.c.l.b16 %v3131_v52 }
  0xcc   : > { %1247 = vrot.lane.b32.xlu1 %v1202_v12, %s2841_s25  ;;  %v868_v12 = vrot.slane %v866_v59, 1  ;;  %v1169_v59 = vunpack.c.l.b16 %v3155_v24 }
  0xcd   : > { %v587_v3 = vpack.c.b16 %v574_v29, %v573_v58  ;;  %v824_v29 = vshll.u32 %v813_v39, 16  ;;  %v571_v58 = vunpack.c.l.b16 %v3157_v40  ;;  %v3186_v39 = vld [vmem:[#allocation2 + $0x18] sm:$0xf] }
  0xce   : > { %v575_v8 = vunpack.c.l.b16 %v3186_v39 }
  0xcf   : > { %v610_v10 = vshll.u32 %v587_v3, 16  ;;  %v608_v42 = vshrl.u32 %v587_v3, 16  ;;  %v826_v62 = vrot.slane %v824_v29, 1  ;;  %v3171_v3 = vld [vmem:[#allocation2 + $0x18] sm:$0xf] }
  0xd0   : > { %v801_v28 = vunpack.c.l.b16 %v3171_v3 }
  0xd1   : > { %891 = vrot.lane.b32.xlu0 %v876_v22, %s2841_s25  ;;  %v1174_v22 = vunpack.c.l.b16 %v3139_v31  ;;  %v612_v49 = vrot.slane %v610_v10, 1 }
  0xd2   : > { %887 = vrot.lane.b32.xlu2 %v862_v21, %s2841_s25  ;;  %v869_v21 = vor.u32 %v868_v12, %v864_v4  ;;  %v1183_v4 = vpack.c.b16 %v1170_v51, %v1169_v59  ;;  %v827_v51 = vor.u32 %v826_v62, %v822_v27  ;;  %v815_v32 = vpack.c.b16 %v802_v16, %v801_v28  ;;  %v3199_v27 = vld [vmem:[#allocation2 + $0x3c] sm:$0x1]  ;;  %v3201_v62 = vld [vmem:[#allocation2 + $0x38] sm:$0xf] }
  0xd3   : > { %v1281_v37 = vpack.c.b16 %v1174_v22, %v1273_v23  ;;  %v613_v47 = vor.u32 %v612_v49, %v608_v42  ;;  %v584_v28 = vunpack.c.l.b16 %v3199_v27 }
  0xd4   : > { %1303 = vrot.lane.b32.xlu1 %v1290_v41, %s2842_s26  ;;  %v1216_v41 = vor.u32 %v1215_v2, %v1211_v6  ;;  %v586_v2 = vpack.c.b16 %v572_v53, %v571_v58  ;;  %v843_v6 = vshrl.u32 %v816_v50, 16  ;;  %v1206_v14 = vshll.u32 %v1183_v4, 16 }
  0xd5   : > { %v1289_v43 = vrot.slane %v1281_v37, 1  ;;  %v1204_v10 = vshrl.u32 %v1183_v4, 16  ;;  %v549_v37 = vld [vmem:[#allocation2 + $0x20] sm:$0xe]  ;;  %v838_v29 = vshll.u32 %v815_v32, 16  ;;  %v836_v31 = vshrl.u32 %v815_v32, 16 }
  0xd6   : > { %v603_v23 = vshll.u32 %v586_v2, 16  ;;  %v601_v36 = vshrl.u32 %v586_v2, 16  ;;  %v588_v4 = vpack.c.b16 %v576_v38, %v575_v8  ;;  %v364_v2 = vld [vmem:[#allocation2 + $0x48] sm:$0x1]  ;;  %v551_v38 = vld [vmem:[#allocation2 + $0x30] sm:$0xe] }
  0xd9   : > { %1245 = vrot.lane.b32.xlu0 %v1195_v25, %s2841_s25  ;;  %v3159_v25 = vld [vmem:[#allocation2 + $0x28] sm:$0xf] }
  0xda   : > { %1297 = vrot.lane.b32.xlu2 %v1287_v54, %s2842_s26  ;;  %v904_v54 = vunpack.c.l.b16 %v776_v34  ;;  %v579_v57 = vunpack.c.l.b16 %v3159_v25  ;;  %v3184_v34 = vld [vmem:[#allocation2 + $0x20] sm:$0xf] }
  0xdb   : > { %v577_v58 = vunpack.c.l.b16 %v3184_v34 }
  0xdc   : > { %879 = vrot.lane.b32.xlu1 %v834_v35, %s2841_s25  ;;  %v691_v35 = vrot.slane %v683_v33, 1  ;;  %v912_v12 = vpack.c.b16 %v804_v7, %v904_v54  ;;  %v590_v13 = vpack.c.b16 %v580_v44, %v579_v57  ;;  %v1208_v7 = vrot.slane %v1206_v14, 1  ;;  %v541_v33 = vld [vmem:[#allocation2 + $0x24] sm:$0x1] }
  0xdd   : > { %v605_v44 = vrot.slane %v603_v23, 1  ;;  %v578_v59 = vunpack.c.l.b16 %v541_v33  ;;  %v365_v14 = vsel %vm2883_vm3, 0, %v364_v2  ;;  %v3219_v33 = vld [vmem:[#allocation2 + $0x40] sm:$0xf] }
  0xde   : > { %v920_v15 = vrot.slane %v912_v12, 1  ;;  %v631_v48 = vshll.u32 %v590_v13, 16  ;;  %v629_v50 = vshrl.u32 %v590_v13, 16  ;;  %v1209_v54 = vor.u32 %v1208_v7, %v1204_v10  ;;  %v3197_v12 = vld [vmem:[#allocation2 + $0x38] sm:$0xf] }
  0xdf   : > { %v589_v57 = vpack.c.b16 %v578_v59, %v577_v58  ;;  %v3203_v13 = vld [vmem:[#allocation2 + $0x34] sm:$0x1]  ;;  %v583_v23 = vunpack.c.l.b16 %v3197_v12  ;;  %366 = vst [vmem:[#allocation2 + $0x48] sm:$0x1] %v365_v14  ;;  %v1175_v10 = vunpack.c.l.b16 %v3201_v62 }
  0xe0   : > { %v633_v42 = vrot.slane %v631_v48, 1  ;;  %v582_v5 = vunpack.c.l.b16 %v3203_v13 }
  0xe1   : > { %707 = vrot.lane.b32.xlu0 %v694_v11, %s2842_s26  ;;  %v847_v11 = vrot.slane %v845_v26, 1  ;;  %v624_v48 = vshll.u32 %v589_v57, 16  ;;  %v592_v32 = vpack.c.b16 %v584_v28, %v583_v23 }
  0xe2   : > { %889 = vrot.lane.b32.xlu2 %v869_v21, %s2841_s25  ;;  %v3175_v21 = vld [vmem:[#allocation2 + $0x30] sm:$0xf]  ;;  %v634_v16 = vor.u32 %v633_v42, %v629_v50  ;;  %v615_v42 = vshrl.u32 %v588_v4, 16  ;;  %v1186_v50 = vpack.c.b16 %v1176_v61, %v1175_v10  ;;  %v2747_v10 = vld [vmem:[%s3756_s1 + $0x8] sm:$0x30] }
  0xe3   : > { %v1173_v53 = vunpack.c.l.b16 %v3175_v21  ;;  %v643_v61 = vshrl.u32 %v592_v32, 16 }
  0xe4   : > { %1251 = vrot.lane.b32.xlu1 %v1216_v41, %s2841_s25  ;;  %v848_v41 = vor.u32 %v847_v11, %v843_v6  ;;  %v397_v6 = vld [vmem:[#allocation2 + $0x4c] sm:$0xf]  ;;  %v1225_v2 = vshrl.u32 %v1186_v50, 16 }
  0xe5   : > { %v1185_v49 = vpack.c.b16 %v1174_v22, %v1173_v53  ;;  %v840_v22 = vrot.slane %v838_v29, 1  ;;  %v617_v53 = vshll.u32 %v588_v4, 16  ;;  %v1177_v29 = vunpack.c.l.b16 %v3219_v33 }
  0xe9   : > { %1301 = vrot.lane.b32.xlu0 %v1289_v43, %s2842_s26  ;;  %v606_v43 = vor.u32 %v605_v44, %v601_v36  ;;  %v679_v36 = vunpack.c.l.b16 %v551_v38  ;;  %v622_v44 = vshrl.u32 %v589_v57, 16 }
  0xea   : > { %701 = vrot.lane.b32.xlu2 %v691_v35, %s2842_s26  ;;  %v677_v35 = vunpack.c.l.b16 %v549_v37  ;;  %v626_v37 = vrot.slane %v624_v48, 1 }
  0xec   : > { %653 = vrot.lane.b32.xlu1 %v613_v47, %s2841_s25  ;;  %v1220_v47 = vshll.u32 %v1185_v49, 16  ;;  %v685_v26 = vpack.c.b16 %v578_v59, %v677_v35  ;;  %v687_v59 = vpack.c.b16 %v582_v5, %v679_v36  ;;  %v3226_v35 = vld [vmem:[#allocation2 + $0x48] sm:$0xf] }
  0xee   : > { %v1222_v11 = vrot.slane %v1220_v47, 1  ;;  %v693_v60 = vrot.slane %v685_v26, 1  ;;  %v627_v47 = vor.u32 %v626_v37, %v622_v44  ;;  %v695_v57 = vrot.slane %v687_v59, 1 }
  0xf1   : > { %877 = vrot.lane.b32.xlu0 %v827_v51, %s2841_s25  ;;  %v1218_v51 = vshrl.u32 %v1185_v49, 16  ;;  %v619_v49 = vrot.slane %v617_v53, 1  ;;  %v2689_v53 = vld [vmem:[%s3756_s1 + $0x8] sm:$0xf] }
  0xf2   : > { %931 = vrot.lane.b32.xlu2 %v920_v15, %s2842_s26  ;;  %v398_v15 = vsel %vm2895_vm5, 0, %v397_v6  ;;  %v3233_v6 = vld [vmem:[#allocation2 + $0x30] sm:$0xf] }
  0xf3   : > { %399 = vst [vmem:[#allocation2 + $0x4c] sm:$0xf] %v398_v15  ;;  %v1223_v7 = vor.u32 %v1222_v11, %v1218_v51  ;;  %v620_v26 = vor.u32 %v619_v49, %v615_v42  ;;  %v552_v15 = vld [vmem:[#allocation2 + $0x38] sm:$0xe]  ;;  %v581_v48 = vunpack.c.l.b16 %v3233_v6  ;;  %v3250_v42 = vpop.permute.xlu1 %649  ;;  %v1148_v49 = vld [vmem:[#allocation2 + $0x48] sm:$0xe] }
  0xf4   : > { %883 = vrot.lane.b32.xlu1 %v848_v41, %s2841_s25  ;;  %v841_v41 = vor.u32 %v840_v22, %v836_v31  ;;  %v1227_v31 = vshll.u32 %v1186_v50, 16 }
  0xf6   : > { %v1229_v13 = vrot.slane %v1227_v31, 1 }
  0xf9   : > { %1249 = vrot.lane.b32.xlu0 %v1209_v54, %s2841_s25  ;;  %v3224_v54 = vld [vmem:[#allocation2 + $0x44] sm:$0x1] }
  0xfa   : > { %651 = vrot.lane.b32.xlu2 %v606_v43, %s2841_s25  ;;  %v645_v43 = vshll.u32 %v592_v32, 16  ;;  %v1178_v58 = vunpack.c.l.b16 %v3224_v54  ;;  %v1140_v8 = vld [vmem:[#allocation2 + $0x4c] sm:$0x1]  ;;  %v2690_v32 = vor.u32 %v2747_v10, %v2689_v53 }
  0xfb   : > { %v1180_v22 = vunpack.c.l.b16 %v1140_v8  ;;  %v591_v8 = vpack.c.b16 %v582_v5, %v581_v48 }
  0xfc   : > { %659 = vrot.lane.b32.xlu1 %v634_v16, %s2841_s25  ;;  %v1179_v16 = vunpack.c.l.b16 %v3226_v35  ;;  %v647_v4 = vrot.slane %v645_v43, 1  ;;  %v1187_v14 = vpack.c.b16 %v1178_v58, %v1177_v29  ;;  %v1024_v37 = vsel %vm1022_vm6, %v2690_v32, 0 }
  0xfd   : > { %2791 = vmatpush.bf16.msra.mxu2 %v1024_v37  ;;  %1033 = vmatpush.bf16.msra.mxu0 %v1024_v37  ;;  %v638_v31 = vshll.u32 %v591_v8, 16 }
  0xfe   : > { %v1188_v30 = vpack.c.b16 %v1180_v22, %v1179_v16  ;;  %v648_v23 = vor.u32 %v647_v4, %v643_v61  ;;  %v1234_v36 = vshll.u32 %v1187_v14, 16  ;;  %v1232_v59 = vshrl.u32 %v1187_v14, 16 }
  0xff   : > { %v1276_v16 = vunpack.c.l.b16 %v1148_v49  ;;  %v640_v4 = vrot.slane %v638_v31, 1 }
 0x100   : > { %v1239_v51 = vshrl.u32 %v1188_v30, 16  ;;  %v1236_v43 = vrot.slane %v1234_v36, 1 }
 0x101   : > { %881 = vrot.lane.b32.xlu0 %v841_v41, %s2841_s25  ;;  %v680_v41 = vunpack.c.l.b16 %v552_v15 }
 0x102   : > { %705 = vrot.lane.b32.xlu2 %v693_v60, %s2842_s26  ;;  %v1241_v60 = vshll.u32 %v1188_v30, 16 }
 0x103   : > { %v688_v29 = vpack.c.b16 %v584_v28, %v680_v41  ;;  %v636_v28 = vshrl.u32 %v591_v8, 16  ;;  %v2746_v8 = vld [vmem:[%s3756_s1] sm:$0x30] }
 0x104   : > { %1253 = vrot.lane.b32.xlu1 %v1223_v7, %s2841_s25  ;;  %v1243_v38 = vrot.slane %v1241_v60, 1  ;;  %v1230_v7 = vor.u32 %v1229_v13, %v1225_v2  ;;  %v1147_v13 = vld [vmem:[#allocation2 + $0x40] sm:$0xe] }
 0x105   : > { %v641_v14 = vor.u32 %v640_v4, %v636_v28  ;;  %v1275_v15 = vunpack.c.l.b16 %v1147_v13 }
 0x106   : > { %v1244_v44 = vor.u32 %v1243_v38, %v1239_v51  ;;  %v2707_v38 = vld [vmem:[%s3756_s1 + $0x10] sm:$0xf] }
 0x107   : > { %v1283_v60 = vpack.c.b16 %v1178_v58, %v1275_v15 }
 0x109   : > { %657 = vrot.lane.b32.xlu0 %v627_v47, %s2841_s25  ;;  %v1237_v47 = vor.u32 %v1236_v43, %v1232_v59  ;;  %v1291_v41 = vrot.slane %v1283_v60, 1 }
 0x10a   : > { %655 = vrot.lane.b32.xlu2 %v620_v26, %s2841_s25  ;;  %v696_v26 = vrot.slane %v688_v29, 1 }
 0x10c   : > { %709 = vrot.lane.b32.xlu1 %v695_v57, %s2842_s26  ;;  %v3236_v11 = vpop.permute.xlu2 %939  ;;  %v1284_v57 = vpack.c.b16 %v1180_v22, %v1276_v16 }
 0x10e   : > { %v1292_v27 = vrot.slane %v1284_v57, 1 }
 0x111   : > { %663 = vrot.lane.b32.xlu0 %v648_v23, %s2841_s25  ;;  %v2748_v23 = vld [vmem:[%s3756_s1 + $0x10] sm:$0x30] }
 0x112   : > { %1255 = vrot.lane.b32.xlu2 %v1230_v7, %s2841_s25  ;;  %v2708_v48 = vor.u32 %v2748_v23, %v2707_v38 }
 0x114   : > { %v3252_v50 = vpop.permute.xlu2 %1293  ;;  %1259 = vrot.lane.b32.xlu1 %v1244_v44, %s2841_s25  ;;  %v1390_v54 = vsel %vm1022_vm6, %v2708_v48, 0 }
 0x115   : > { %1399 = vmatpush.bf16.msrb.mxu2 %v1390_v54 }
 0x119   : > { %1257 = vrot.lane.b32.xlu0 %v1237_v47, %s2841_s25 }
 0x11a   : > { %711 = vrot.lane.b32.xlu2 %v696_v26, %s2842_s26 }
 0x11b   : > { %v934_v30 = vpop.permute.xlu0 %933 }
 0x11c   : > { %v3259_v61 = vpop.permute.xlu2 %927  ;;  %v936_v2 = vpop.permute.xlu1 %935 }
 0x121   : > { %1307 = vrot.lane.b32.xlu0 %v1292_v27, %s2842_s26 }
 0x122   : > { %661 = vrot.lane.b32.xlu2 %v641_v14, %s2841_s25 }
 0x123   : > { %v1296_v5 = vpop.permute.xlu0 %1295 }
 0x124   : > { %v886_v51 = vpop.permute.xlu2 %885 }
 0x125   : > { %v955_v53 = vsel %vm713_vm7, %v3050_v56, %v886_v51 }
 0x126   : > { %v938_v22 = vpop.permute.xlu1 %937  ;;  %v974_v58 = vsel %vm738_vm8, %v955_v53, %v934_v30 }
 0x127   : > { %v996_v37 = vunpack.c.l.b16 %v974_v58 }
 0x12a   : > { %1305 = vrot.lane.b32.xlu2 %v1291_v41, %s2842_s26  ;;  %v2829_v41 = vld [vmem:[#allocation2] sm:$0xf] }
 0x12b   : > { %v700_v7 = vpop.permute.xlu0 %699 }
 0x12c   : > { %v888_v10 = vpop.permute.xlu2 %887 }
 0x12d   : > { %v958_v36 = vsel %vm713_vm7, %v3074_v19, %v888_v10  ;;  %v2697_v19 = vld [vmem:[%s3756_s1] sm:$0xf] }
 0x12e   : > { %v976_v44 = vsel %vm738_vm8, %v958_v36, %v936_v2  ;;  %v3279_v32 = vpop.permute.xlu1 %925  ;;  %v2698_v16 = vor.u32 %v2746_v8, %v2697_v19 }
 0x12f   : > { %v997_v49 = vunpack.c.l.b16 %v976_v44 }
 0x130   : > { %v1093_v31 = vsel %vm1022_vm6, %v2698_v16, 0 }
 0x131   : > { %v1002_v56 = vpack.c.b16 %v997_v49, %v996_v37  ;;  %1102 = vmatpush.bf16.msra.mxu1 %v1093_v31  ;;  %2792 = vmatpush.bf16.msra.mxu3 %v1093_v31 }
 0x133   : > { %2693 = vmatmul.msk.bf16.vlgmr.msra.gmra.mxu2 %vm1009_vm9, %v1002_v56  ;;  %v3284_v43 = vpop.permute.xlu0 %1299 }
 0x134   : > { %v3282_v59 = vpop.permute.xlu2 %1297 }
 0x136   : > { %v3286_v29 = vpop.permute.xlu1 %929 }
 0x13b   : > { %v704_v26 = vpop.permute.xlu0 %703 }
 0x13c   : > { %v890_v47 = vpop.permute.xlu2 %889 }
 0x13d   : > { %v961_v30 = vsel %vm713_vm7, %v3108_v9, %v890_v47 }
 0x13e   : > { %v1248_v57 = vpop.permute.xlu1 %1247  ;;  %v978_v4 = vsel %vm738_vm8, %v961_v30, %v938_v22 }
 0x13f   : > { %v998_v15 = vunpack.c.l.b16 %v978_v4  ;;  %v1314_v48 = vsel %vm713_vm7, %v3059_v1, %v1248_v57 }
 0x140   : > { %v1336_v54 = vsel %vm738_vm8, %v1314_v48, %v1296_v5 }
 0x141   : > { %v1361_v49 = vunpack.c.l.b16 %v1336_v54 }
 0x143   : > { %v892_v13 = vpop.permute.xlu0 %891 }
 0x144   : > { %v702_v2 = vpop.permute.xlu2 %701  ;;  %v964_v27 = vsel %vm713_vm7, %v3076_v20, %v892_v13  ;;  %v716_v20 = vsel %vm713_vm7, %v2829_v41, %v3250_v42 }
 0x145   : > { %v980_v14 = vsel %vm738_vm8, %v964_v27, %v3236_v11  ;;  %v740_v53 = vsel %vm738_vm8, %v716_v20, %v3214_v0 }
 0x146   : > { %v3300_v28 = vpop.permute.xlu1 %1303  ;;  %v999_v51 = vunpack.c.l.b16 %v980_v14  ;;  %v1063_v37 = vunpack.c.l.b16 %v740_v53 }
 0x148   : > { %v1003_v60 = vpack.c.b16 %v999_v51, %v998_v15 }
 0x14a   : > { %2694 = vmatmul.msk.bf16.gmra.mxu2 %vm1009_vm9, %v1003_v60 }
 0x14b   : > { %v1246_v23 = vpop.permute.xlu0 %1245 }
 0x14c   : > { %v932_v38 = vpop.permute.xlu2 %931  ;;  %v1311_v22 = vsel %vm713_vm7, %v3094_v45, %v1246_v23 }
 0x14d   : > { %v1334_v11 = vsel %vm738_vm8, %v1311_v22, %v3252_v50 }
 0x14e   : > { %v880_v9 = vpop.permute.xlu1 %879  ;;  %v1360_v36 = vunpack.c.l.b16 %v1334_v11 }
 0x14f   : > { %v946_v8 = vsel %vm713_vm7, %v3096_v55, %v880_v9 }
 0x150   : > { %v1368_v56 = vpack.c.b16 %v1361_v49, %v1360_v36 }
 0x153   : > { %v708_v58 = vpop.permute.xlu0 %707 }
 0x154   : > { %v652_v10 = vpop.permute.xlu2 %651 }
 0x155   : > { %v719_v45 = vsel %vm713_vm7, %v3157_v40, %v652_v10 }
 0x156   : > { %v1252_v44 = vpop.permute.xlu1 %1251  ;;  %v742_v42 = vsel %vm738_vm8, %v719_v45, %v700_v7  ;;  %v968_v7 = vsel %vm738_vm8, %v946_v8, %v3259_v61 }
 0x157   : > { %v1064_v1 = vunpack.c.l.b16 %v742_v42 }
 0x159   : > { %v1071_v19 = vpack.c.b16 %v1064_v1, %v1063_v37 }
 0x15a   : > { %2709 = vmatmul.msk.bf16.vlgmr.msrb.gmra.mxu2 %vm1009_vm9, %v1368_v56 }
 0x15b   : > { %2699 = vmatmul.msk.bf16.vlgmr.msra.gmra.mxu1 %vm1009_vm9, %v1071_v19  ;;  %v1302_v0 = vpop.permute.xlu0 %1301 }
 0x15c   : > { %v706_v50 = vpop.permute.xlu2 %705 }
 0x15e   : > { %v654_v5 = vpop.permute.xlu1 %653 }
 0x15f   : > { %v722_v40 = vsel %vm713_vm7, %v3131_v52, %v654_v5  ;;  %v993_v52 = vunpack.c.l.b16 %v968_v7 }
 0x160   : > { %v744_v16 = vsel %vm738_vm8, %v722_v40, %v702_v2  ;;  %v1320_v2 = vsel %vm713_vm7, %v3114_v18, %v1252_v44 }
 0x161   : > { %v1065_v27 = vunpack.c.l.b16 %v744_v16 }
 0x163   : > { %v878_v47 = vpop.permute.xlu0 %877 }
 0x164   : > { %v656_v31 = vpop.permute.xlu2 %655  ;;  %v943_v57 = vsel %vm713_vm7, %v3141_v63, %v878_v47  ;;  %v1340_v63 = vsel %vm738_vm8, %v1320_v2, %v3284_v43 }
 0x165   : > { %v725_v30 = vsel %vm713_vm7, %v3186_v39, %v656_v31  ;;  %v966_v55 = vsel %vm738_vm8, %v943_v57, %v3279_v32  ;;  %v1363_v23 = vunpack.c.l.b16 %v1340_v63 }
 0x166   : > { %v884_v4 = vpop.permute.xlu1 %883  ;;  %v746_v13 = vsel %vm738_vm8, %v725_v30, %v704_v26  ;;  %v992_v14 = vunpack.c.l.b16 %v966_v55 }
 0x167   : > { %v1066_v61 = vunpack.c.l.b16 %v746_v13  ;;  %v952_v18 = vsel %vm713_vm7, %v3143_v17, %v884_v4 }
 0x168   : > { %v1000_v15 = vpack.c.b16 %v993_v52, %v992_v14  ;;  %v972_v20 = vsel %vm738_vm8, %v952_v18, %v932_v38  ;;  %v1460_v14 = vld [vmem:[#allocation3 + $0x8] sm:$0x1]  ;;  %v1466_v18 = vld [vmem:[#allocation3 + $0x18] sm:$0x1] }
 0x169   : > { %v1072_v51 = vpack.c.b16 %v1066_v61, %v1065_v27 }
 0x16a   : > { %2691 = vmatmul.msk.bf16.vlgmr.msra.gmra.mxu0 %vm1009_vm9, %v1000_v15  ;;  %v1461_v15 = vsel %vm3390_vm12, 0, %v1460_v14 }
 0x16b   : > { %2700 = vmatmul.msk.bf16.gmra.mxu1 %vm1009_vm9, %v1072_v51  ;;  %v1250_v39 = vpop.permute.xlu0 %1249  ;;  %1462 = vst [vmem:[#allocation3 + $0x8] sm:$0x1] %v1461_v15 }
 0x16c   : > { %v1317_v32 = vsel %vm713_vm7, %v3155_v24, %v1250_v39  ;;  %v1256_v41 = vpop.permute.xlu2 %1255 }
 0x16d   : > { %v1338_v60 = vsel %vm738_vm8, %v1317_v32, %v3282_v59  ;;  %v995_v59 = vunpack.c.l.b16 %v972_v20  ;;  %v1326_v10 = vsel %vm713_vm7, %v3201_v62, %v1256_v41  ;;  %v1463_v32 = vld [vmem:[#allocation3 + $0x10] sm:$0x1]  ;;  %v1467_v20 = vsel %vm3390_vm12, 0, %v1466_v18 }
 0x16e   : > { %v660_v26 = vpop.permute.xlu1 %659  ;;  %v1362_v9 = vunpack.c.l.b16 %v1338_v60  ;;  %v1464_v60 = vsel %vm3390_vm12, 0, %v1463_v32  ;;  %1468 = vst [vmem:[#allocation3 + $0x18] sm:$0x1] %v1467_v20 }
 0x16f   : > { %v731_v17 = vsel %vm713_vm7, %v3159_v25, %v660_v26  ;;  %v1495_v26 = vld [vmem:[#allocation3 + $0x14] sm:$0xf]  ;;  %1465 = vst [vmem:[#allocation3 + $0x10] sm:$0x1] %v1464_v60 }
 0x170   : > { %v1369_v22 = vpack.c.b16 %v1363_v23, %v1362_v9  ;;  %v1496_v23 = vsel %vm3398_vm13, 0, %v1495_v26 }
 0x171   : > { %1497 = vst [vmem:[#allocation3 + $0x14] sm:$0xf] %v1496_v23 }
 0x172   : > { %2710 = vmatmul.msk.bf16.gmra.mxu2 %vm1009_vm9, %v1369_v22  ;;  %v1498_v22 = vld [vmem:[#allocation3 + $0x1c] sm:$0xf] }
 0x173   : > { %v882_v43 = vpop.permute.xlu0 %881  ;;  %v1499_v46 = vsel %vm3398_vm13, 0, %v1498_v22 }
 0x174   : > { %v949_v48 = vsel %vm713_vm7, %v3171_v3, %v882_v43  ;;  %v750_v3 = vsel %vm738_vm8, %v731_v17, %v708_v58  ;;  %v712_v45 = vpop.permute.xlu2 %711  ;;  %1500 = vst [vmem:[#allocation3 + $0x1c] sm:$0xf] %v1499_v46 }
 0x175   : > { %v970_v11 = vsel %vm738_vm8, %v949_v48, %v3286_v29  ;;  %v1344_v29 = vsel %vm738_vm8, %v1326_v10, %v3300_v28  ;;  %v1068_v37 = vunpack.c.l.b16 %v750_v3 }
 0x176   : > { %v1254_v24 = vpop.permute.xlu1 %1253  ;;  %v994_v54 = vunpack.c.l.b16 %v970_v11  ;;  %v1365_v62 = vunpack.c.l.b16 %v1344_v29  ;;  %v1614_v22 = vld [vmem:[#allocation3 + $0x10] sm:$0xf] }
 0x177   : > { %v1323_v53 = vsel %vm713_vm7, %v3175_v21, %v1254_v24  ;;  %v3420_v24 = vld [vmem:[%s3757_s2] ss:$0 sm:$0xff] }
 0x178   : > { %v1001_v38 = vpack.c.b16 %v995_v59, %v994_v54  ;;  %v1342_v36 = vsel %vm738_vm8, %v1323_v53, %v1302_v0  ;;  %v1469_v59 = vld [vmem:[#allocation3 + $0x20] sm:$0x1]  ;;  %v1501_v53 = vld [vmem:[#allocation3 + $0x24] sm:$0xf] }
 0x179   : > { %v1364_v21 = vunpack.c.l.b16 %v1342_v36  ;;  %v1470_v17 = vsel %vm3390_vm12, 0, %v1469_v59  ;;  %v1502_v10 = vsel %vm3398_vm13, 0, %v1501_v53 }
 0x17a   : > { %2692 = vmatmul.msk.bf16.gmra.mxu0 %vm1009_vm9, %v1001_v38  ;;  %1471 = vst [vmem:[#allocation3 + $0x20] sm:$0x1] %v1470_v17 }
 0x17b   : > { %v658_v44 = vpop.permute.xlu0 %657  ;;  %v1370_v56 = vpack.c.b16 %v1365_v62, %v1364_v21  ;;  %1503 = vst [vmem:[#allocation3 + $0x24] sm:$0xf] %v1502_v10  ;;  %v1608_v62 = vld [vmem:[#allocation3 + $0x8] sm:$0xf] }
 0x17c   : > { %v728_v42 = vsel %vm713_vm7, %v3184_v34, %v658_v44  ;;  %v662_v19 = vpop.permute.xlu2 %661 }
 0x17d   : > { %v748_v25 = vsel %vm738_vm8, %v728_v42, %v706_v50  ;;  %v734_v34 = vsel %vm713_vm7, %v3233_v6, %v662_v19 }
 0x17e   : > { %v1067_v49 = vunpack.c.l.b16 %v748_v25  ;;  %v710_v28 = vpop.permute.xlu1 %709  ;;  %v1457_v25 = vld [vmem:[#allocation3] sm:$0x1] }
 0x17f   : > { %v752_v5 = vsel %vm738_vm8, %v734_v34, %v710_v28 }
 0x180   : > { %v1073_v1 = vpack.c.b16 %v1068_v37, %v1067_v49  ;;  %v1069_v7 = vunpack.c.l.b16 %v752_v5  ;;  %v1489_v37 = vld [vmem:[#allocation3 + $0x4] sm:$0xf]  ;;  %v1458_v49 = vsel %vm3390_vm12, 0, %v1457_v25  ;;  %v1504_v5 = vld [vmem:[#allocation3 + $0x2c] sm:$0xf] }
 0x181   : > { %1459 = vst [vmem:[#allocation3] sm:$0x1] %v1458_v49 }
 0x182   : > { %2701 = vmatmul.msk.bf16.vlgmr.msra.gmra.mxu3 %vm1009_vm9, %v1073_v1  ;;  %2711 = vmatmul.msk.bf16.gmra.mxu2 %vm1009_vm9, %v1370_v56  ;;  %v1490_v1 = vsel %vm3398_vm13, 0, %v1489_v37 }
 0x183   : > { %v664_v58 = vpop.permute.xlu0 %663  ;;  %1491 = vst [vmem:[#allocation3 + $0x4] sm:$0xf] %v1490_v1 }
 0x184   : > { %v737_v0 = vsel %vm713_vm7, %v3197_v12, %v664_v58  ;;  %v1306_v57 = vpop.permute.xlu2 %1305 }
 0x185   : > { %v754_v50 = vsel %vm738_vm8, %v737_v0, %v712_v45 }
 0x186   : > { %v1070_v40 = vunpack.c.l.b16 %v754_v50  ;;  %v1260_v16 = vpop.permute.xlu1 %1259  ;;  %v1472_v50 = vld [vmem:[#allocation3 + $0x28] sm:$0x1] }
 0x187   : > { %v1332_v30 = vsel %vm713_vm7, %v3226_v35, %v1260_v16  ;;  %v1492_v35 = vld [vmem:[#allocation3 + $0xc] sm:$0xf]  ;;  %v1473_v16 = vsel %vm3390_vm12, 0, %v1472_v50 }
 0x188   : > { %v1074_v31 = vpack.c.b16 %v1070_v40, %v1069_v7  ;;  %v1493_v63 = vsel %vm3398_vm13, 0, %v1492_v35  ;;  %1474 = vst [vmem:[#allocation3 + $0x28] sm:$0x1] %v1473_v16  ;;  %v1623_v16 = vld [vmem:[#allocation3 + $0x1c] sm:$0x1] }
 0x189   : > { %1494 = vst [vmem:[#allocation3 + $0xc] sm:$0xf] %v1493_v63  ;;  %v1656_v63 = vld [vmem:[#allocation3] sm:$0xf] }
 0x18a   : > { %v1696_v18 = vunpack.c.l.b16 %v1656_v63 }
 0x18b   : > { %v1258_v8 = vpop.permute.xlu0 %1257 }
 0x18c   : > { %v1329_v47 = vsel %vm713_vm7, %v3219_v33, %v1258_v8 }
 0x18d   : > { %v1346_v12 = vsel %vm738_vm8, %v1329_v47, %v1306_v57  ;;  %v1505_v57 = vsel %vm3398_vm13, 0, %v1504_v5 }
 0x18e   : > { %v1366_v55 = vunpack.c.l.b16 %v1346_v12  ;;  %1506 = vst [vmem:[#allocation3 + $0x2c] sm:$0xf] %v1505_v57 }
 0x190   : > { %v1611_v19 = vld [vmem:[#allocation3 + $0xc] sm:$0x1] }
 0x192   : > { %2702 = vmatmul.msk.bf16.gmra.mxu3 %vm1009_vm9, %v1074_v31  ;;  %v1672_v31 = vld [vmem:[#allocation3] sm:$0xe] }
 0x193   : > { %v1308_v6 = vpop.permute.xlu0 %1307  ;;  %v1800_v32 = vunpack.c.l.b16 %v1672_v31 }
 0x194   : > { %v1348_v4 = vsel %vm738_vm8, %v1332_v30, %v1308_v6 }
 0x195   : > { %v1367_v13 = vunpack.c.l.b16 %v1348_v4 }
 0x197   : > { %v1371_v52 = vpack.c.b16 %v1367_v13, %v1366_v55  ;;  %v1475_v55 = vld [vmem:[#allocation3 + $0x30] sm:$0x1]  ;;  %v1507_v13 = vld [vmem:[#allocation3 + $0x34] sm:$0xf] }
 0x198   : > { %v1508_v14 = vsel %vm3398_vm13, 0, %v1507_v13 }
 0x199   : > { %2712 = vmatmul.msk.bf16.gmra.mxu2 %vm1009_vm9, %v1371_v52  ;;  %v1476_v52 = vsel %vm3390_vm12, 0, %v1475_v55  ;;  %1509 = vst [vmem:[#allocation3 + $0x34] sm:$0xf] %v1508_v14 }
 0x19a   : > { %1477 = vst [vmem:[#allocation3 + $0x30] sm:$0x1] %v1476_v52 }
 0x1b6   : > { %v3383_v27 = vpop.f32.mrf.mxu2 }
 0x1be   : > { %v3385_v33 = vpop.f32.mrf.mxu2 }
 0x1cd   : > { %v3387_v61 = vpop.f32.mrf.mxu2 }
 0x1d5   : > { %v3407_v39 = vpop.f32.mrf.mxu2 }
 0x1d8   : > { %v1104_v9 = vpop.f32.mrf.mxu1 }
 0x1dd   : > { %v1401_v41 = vpop.f32.mrf.mxu2 }
 0x1e0   : > { %v1106_v54 = vpop.f32.mrf.mxu1 }
 0x1e5   : > { %v1403_v36 = vpop.f32.mrf.mxu2 }
 0x1e7   : > { %v1035_v43 = vpop.f32.mrf.mxu0 }
 0x1e8   : > { %v1105_v48 = vadd.f32 %v1104_v9, %v1035_v43  ;;  %v1109_v0 = vpop.f32.mrf.mxu1  ;;  %v1664_v9 = vld [vmem:[#allocation3 + $0x4] sm:$0x1] }
 0x1e9   : > { %v1697_v46 = vunpack.c.l.b16 %v1664_v9 }
 0x1ea   : > { %v1421_v11 = vadd.f32 %v1401_v41, %v1105_v48  ;;  %v1617_v41 = vld [vmem:[#allocation3 + $0x14] sm:$0x1] }
 0x1eb   : > { %v1808_v17 = vpack.c.b16 %v1697_v46, %v1800_v32 }
 0x1ec   : > { %v1433_v38 = vadd.f32 %v3420_v24, %v1421_v11 }
 0x1ed   : > { %v1816_v25 = vrot.slane %v1808_v17, 1 }
 0x1ee   : > { %v1441_v3 = vmax.f32 %v1433_v38, 0.0 }
 0x1ef   : > { %v1037_v29 = vpop.f32.mrf.mxu0  ;;  %1824 = vrot.lane.b32.xlu1 %v1816_v25, %s2843_s16  ;;  %v1629_v25 = vld [vmem:[#allocation3 + $0x24] sm:$0x1] }
 0x1f0   : > { %v1519_v45 = vpack.c.bf16 %v1441_v3, %v1441_v3  ;;  %v1107_v44 = vadd.f32 %v1106_v54, %v1037_v29  ;;  %v1111_v59 = vpop.f32.mrf.mxu1  ;;  %v1712_v54 = vpack.c.b16 %v1697_v46, %v1696_v18 }
 0x1f2   : > { %v1528_v21 = vshrl.u32 %v1519_v45, 16  ;;  %v1422_v42 = vadd.f32 %v1403_v36, %v1107_v44  ;;  %v1531_v58 = vshll.u32 %v1519_v45, 16 }
 0x1f4   : > { %v1530_v56 = vrot.slane %v1528_v21, 7  ;;  %v1434_v28 = vadd.f32 %v3420_v24, %v1422_v42  ;;  %v1721_v21 = vshrl.u32 %v1712_v54, 16  ;;  %v1723_v42 = vshll.u32 %v1712_v54, 16 }
 0x1f5   : > { %v1406_v34 = vpop.f32.mrf.mxu2 }
 0x1f6   : > { %v1533_v8 = vor.u32 %v1531_v58, %v1530_v56  ;;  %v1534_v40 = vrot.slane %v1530_v56, 4  ;;  %v1442_v7 = vmax.f32 %v1434_v28, 0.0  ;;  %v1725_v56 = vrot.slane %v1723_v42, 1  ;;  %v1626_v42 = vld [vmem:[#allocation3 + $0x20] sm:$0xf] }
 0x1f7   : > { %v1040_v47 = vpop.f32.mrf.mxu0 }
 0x1f8   : > { %v1609_v30 = vsel %vm3398_vm13, %v1533_v8, %v1608_v62  ;;  %v1612_v12 = vsel %vm3390_vm12, %v1534_v40, %v1611_v19  ;;  %v1520_v6 = vpack.c.bf16 %v1442_v7, %v1442_v7  ;;  %v1110_v4 = vadd.f32 %v1109_v0, %v1040_v47  ;;  %v1620_v7 = vld [vmem:[#allocation3 + $0x18] sm:$0xf] }
 0x1f9   : > { %1610 = vst [vmem:[#allocation3 + $0x8] sm:$0xf] %v1609_v30  ;;  %v1726_v47 = vor.u32 %v1725_v56, %v1721_v21 }
 0x1fa   : > { %1613 = vst [vmem:[#allocation3 + $0xc] sm:$0x1] %v1612_v12  ;;  %v1536_v35 = vshrl.u32 %v1520_v6, 16  ;;  %v1423_v15 = vadd.f32 %v1406_v34, %v1110_v4  ;;  %v1539_v60 = vshll.u32 %v1520_v6, 16 }
 0x1fb   : > { %1776 = vrot.lane.b32.xlu2 %v1726_v47, %s2842_s26 }
 0x1fc   : > { %v1538_v26 = vrot.slane %v1536_v35, 7  ;;  %v1435_v23 = vadd.f32 %v3420_v24, %v1423_v15 }
 0x1fd   : > { %v1408_v20 = vpop.f32.mrf.mxu2 }
 0x1fe   : > { %v1541_v43 = vor.u32 %v1539_v60, %v1538_v26  ;;  %v1542_v48 = vrot.slane %v1538_v26, 4  ;;  %v1443_v11 = vmax.f32 %v1435_v23, 0.0 }
 0x1ff   : > { %v1042_v53 = vpop.f32.mrf.mxu0 }
 0x200   : > { %v1615_v10 = vsel %vm3398_vm13, %v1541_v43, %v1614_v22  ;;  %v1618_v38 = vsel %vm3390_vm12, %v1542_v48, %v1617_v41  ;;  %v1521_v36 = vpack.c.bf16 %v1443_v11, %v1443_v11  ;;  %v1112_v3 = vadd.f32 %v1111_v59, %v1042_v53  ;;  %v1900_v29 = vld [vmem:[#allocation3 + $0x8] sm:$0xe] }
 0x201   : > { %v1673_v45 = vld [vmem:[#allocation3 + $0x8] sm:$0xe]  ;;  %1616 = vst [vmem:[#allocation3 + $0x10] sm:$0xf] %v1615_v10  ;;  %v2028_v37 = vunpack.c.l.b16 %v1900_v29  ;;  %v1892_v1 = vld [vmem:[#allocation3 + $0xc] sm:$0x1] }
 0x202   : > { %v3449_v44 = vld [vmem:[#allocation3 + $0x8] sm:$0xf]  ;;  %1619 = vst [vmem:[#allocation3 + $0x14] sm:$0x1] %v1618_v38  ;;  %v1544_v62 = vshrl.u32 %v1521_v36, 16  ;;  %v1424_v49 = vadd.f32 %v1408_v20, %v1112_v3  ;;  %v1925_v58 = vunpack.c.l.b16 %v1892_v1  ;;  %v1801_v28 = vunpack.c.l.b16 %v1673_v45 }
 0x203   : > { %v1665_v19 = vld [vmem:[#allocation3 + $0xc] sm:$0x1]  ;;  %v1924_v0 = vunpack.c.l.b16 %v3449_v44  ;;  %v1547_v50 = vshll.u32 %v1521_v36, 16  ;;  %v3454_v40 = vld [vmem:[#allocation3 + $0x8] sm:$0xf] }
 0x204   : > { %v1546_v34 = vrot.slane %v1544_v62, 7  ;;  %v1436_v5 = vadd.f32 %v3420_v24, %v1424_v49  ;;  %v1699_v8 = vunpack.c.l.b16 %v1665_v19  ;;  %v2036_v57 = vpack.c.b16 %v1925_v58, %v2028_v37 }
 0x205   : > { %v1114_v31 = vpop.f32.mrf.mxu3  ;;  %v1940_v30 = vpack.c.b16 %v1925_v58, %v1924_v0  ;;  %v1698_v12 = vunpack.c.l.b16 %v3454_v40  ;;  %v1411_v52 = vpop.f32.mrf.mxu2 }
 0x206   : > { %v1549_v6 = vor.u32 %v1547_v50, %v1546_v34  ;;  %v1550_v4 = vrot.slane %v1546_v34, 4  ;;  %v1444_v55 = vmax.f32 %v1436_v5, 0.0  ;;  %v1115_v13 = vadd.f32 %v1114_v31, %v3383_v27 }
 0x207   : > { %v2044_v14 = vrot.slane %v2036_v57, 1  ;;  %v1809_v35 = vpack.c.b16 %v1699_v8, %v1801_v28  ;;  %v1951_v15 = vshll.u32 %v1940_v30, 16  ;;  %v1949_v27 = vshrl.u32 %v1940_v30, 16 }
 0x208   : > { %v1621_v63 = vsel %vm3398_vm13, %v1549_v6, %v1620_v7  ;;  %v1624_v32 = vsel %vm3390_vm12, %v1550_v4, %v1623_v16  ;;  %v1522_v26 = vpack.c.bf16 %v1444_v55, %v1444_v55  ;;  %v1425_v60 = vadd.f32 %v1411_v52, %v1115_v13  ;;  %v2277_v23 = vld [vmem:[#allocation3 + $0x10] sm:$0xe]  ;;  %v1478_v16 = vld [vmem:[#allocation3 + $0x38] sm:$0x1]  ;;  %v1632_v6 = vld [vmem:[#allocation3 + $0x28] sm:$0xf] }
 0x209   : > { %v1901_v9 = vld [vmem:[#allocation3 + $0x10] sm:$0xe]  ;;  %1622 = vst [vmem:[#allocation3 + $0x18] sm:$0xf] %v1621_v63  ;;  %2052 = vrot.lane.b32.xlu0 %v2044_v14, %s2843_s16  ;;  %v1953_v22 = vrot.slane %v1951_v15, 1  ;;  %v2405_v20 = vunpack.c.l.b16 %v2277_v23  ;;  %v1713_v46 = vpack.c.b16 %v1699_v8, %v1698_v12  ;;  %v1817_v11 = vrot.slane %v1809_v35, 1 }
 0x20a   : > { %v3463_v18 = vld [vmem:[#allocation3 + $0x10] sm:$0xf]  ;;  %v2269_v41 = vld [vmem:[#allocation3 + $0x14] sm:$0x1]  ;;  %1625 = vst [vmem:[#allocation3 + $0x1c] sm:$0x1] %v1624_v32  ;;  %v1437_v48 = vadd.f32 %v3420_v24, %v1425_v60  ;;  %v2029_v21 = vunpack.c.l.b16 %v1901_v9 }
 0x20b   : > { %v1552_v43 = vshrl.u32 %v1522_v26, 16  ;;  %v2302_v59 = vunpack.c.l.b16 %v2269_v41  ;;  %v1893_v53 = vld [vmem:[#allocation3 + $0x14] sm:$0x1]  ;;  %v1555_v54 = vshll.u32 %v1522_v26, 16  ;;  %v1954_v17 = vor.u32 %v1953_v22, %v1949_v27  ;;  %v3467_v36 = vld [vmem:[#allocation3 + $0x10] sm:$0xf]  ;;  %1826 = vrot.lane.b32.xlu2 %v1817_v11, %s2843_s16 }
 0x20c   : > { %v1730_v10 = vshll.u32 %v1713_v46, 16  ;;  %v1927_v38 = vunpack.c.l.b16 %v1893_v53  ;;  %v1445_v29 = vmax.f32 %v1437_v48, 0.0  ;;  %v1728_v45 = vshrl.u32 %v1713_v46, 16  ;;  %v1666_v34 = vld [vmem:[#allocation3 + $0x14] sm:$0x1] }
 0x20d   : > { %v1554_v3 = vrot.slane %v1552_v43, 7  ;;  %2004 = vrot.lane.b32.xlu1 %v1954_v17, %s2842_s26  ;;  %v1116_v37 = vpop.f32.mrf.mxu3  ;;  %v2413_v62 = vpack.c.b16 %v2302_v59, %v2405_v20  ;;  %v1926_v1 = vunpack.c.l.b16 %v3463_v18  ;;  %v2301_v56 = vunpack.c.l.b16 %v3467_v36  ;;  %v1674_v7 = vld [vmem:[#allocation3 + $0x10] sm:$0xe]  ;;  %v1413_v30 = vpop.f32.mrf.mxu2  ;;  %v1510_v12 = vld [vmem:[#allocation3 + $0x3c] sm:$0xf] }
 0x20e   : > { %v1732_v49 = vrot.slane %v1730_v10, 1  ;;  %v1523_v28 = vpack.c.bf16 %v1445_v29, %v1445_v29  ;;  %v1117_v0 = vadd.f32 %v1116_v37, %v3385_v33  ;;  %v2037_v5 = vpack.c.b16 %v1927_v38, %v2029_v21  ;;  %v1635_v4 = vld [vmem:[#allocation3 + $0x2c] sm:$0x1]  ;;  %v3483_v32 = vld [vmem:[#allocation3 + $0x10] sm:$0xf] }
 0x20f   : > { %v1557_v58 = vor.u32 %v1555_v54, %v1554_v3  ;;  %v1558_v19 = vrot.slane %v1554_v3, 4  ;;  %v3474_v8 = vpack.c.b16 %v1927_v38, %v1926_v1  ;;  %v2421_v13 = vrot.slane %v2413_v62, 1  ;;  %v1481_v3 = vld [vmem:[#allocation3 + $0x40] sm:$0x1]  ;;  %v1513_v21 = vld [vmem:[#allocation3 + $0x44] sm:$0xf] }
 0x210   : > { %v1733_v50 = vor.u32 %v1732_v49, %v1728_v45  ;;  %v1560_v57 = vshrl.u32 %v1523_v28, 16  ;;  %v1563_v33 = vshll.u32 %v1523_v28, 16  ;;  %v1426_v55 = vadd.f32 %v1413_v30, %v1117_v0  ;;  %v2278_v20 = vld [vmem:[#allocation3 + $0x18] sm:$0xe] }
 0x211   : > { %v1627_v47 = vsel %vm3398_vm13, %v1557_v58, %v1626_v42  ;;  %v1630_v31 = vsel %vm3390_vm12, %v1558_v19, %v1629_v25  ;;  %v1701_v52 = vunpack.c.l.b16 %v1666_v34  ;;  %v2317_v35 = vpack.c.b16 %v2302_v59, %v2301_v56  ;;  %v2270_v11 = vld [vmem:[#allocation3 + $0x1c] sm:$0x1]  ;;  %v3491_v59 = vld [vmem:[#allocation3 + $0x18] sm:$0xf] }
 0x212   : > { %1628 = vst [vmem:[#allocation3 + $0x20] sm:$0xf] %v1627_v47  ;;  %1778 = vrot.lane.b32.xlu0 %v1733_v50, %s2842_s26  ;;  %v1562_v14 = vrot.slane %v1560_v57, 7  ;;  %v1802_v15 = vunpack.c.l.b16 %v1674_v7  ;;  %v1479_v63 = vsel %vm3390_vm12, 0, %v1478_v16  ;;  %v1438_v26 = vadd.f32 %v3420_v24, %v1426_v55  ;;  %v1894_v58 = vld [vmem:[#allocation3 + $0x1c] sm:$0x1] }
 0x213   : > { %1631 = vst [vmem:[#allocation3 + $0x24] sm:$0x1] %v1630_v31  ;;  %v2045_v60 = vrot.slane %v2037_v5, 1  ;;  %v1958_v23 = vshll.u32 %v3474_v8, 16  ;;  %v1511_v9 = vsel %vm3398_vm13, 0, %v1510_v12  ;;  %v2328_v41 = vshll.u32 %v2317_v35, 16  ;;  %2429 = vrot.lane.b32.xlu2 %v2421_v13, %s2843_s16 }
 0x214   : > { %1480 = vst [vmem:[#allocation3 + $0x38] sm:$0x1] %v1479_v63  ;;  %v1565_v27 = vor.u32 %v1563_v33, %v1562_v14  ;;  %v1566_v22 = vrot.slane %v1562_v14, 4  ;;  %v1446_v46 = vmax.f32 %v1438_v26, 0.0  ;;  %v2326_v43 = vshrl.u32 %v2317_v35, 16 }
 0x215   : > { %1512 = vst [vmem:[#allocation3 + $0x3c] sm:$0xf] %v1511_v9  ;;  %2054 = vrot.lane.b32.xlu1 %v2045_v60, %s2843_s16  ;;  %v1700_v48 = vunpack.c.l.b16 %v3483_v32  ;;  %v1119_v17 = vpop.f32.mrf.mxu3  ;;  %v2330_v10 = vrot.slane %v2328_v41, 1  ;;  %v1810_v38 = vpack.c.b16 %v1701_v52, %v1802_v15  ;;  %v1960_v45 = vrot.slane %v1958_v23, 1  ;;  %v3506_v16 = vld [vmem:[#allocation3 + $0x18] sm:$0xf] }
 0x216   : > { %v1633_v53 = vsel %vm3398_vm13, %v1565_v27, %v1632_v6  ;;  %v1636_v54 = vsel %vm3390_vm12, %v1566_v22, %v1635_v4  ;;  %v1524_v29 = vpack.c.bf16 %v1446_v46, %v1446_v46  ;;  %v2304_v25 = vunpack.c.l.b16 %v2270_v11  ;;  %v1638_v47 = vld [vmem:[#allocation3 + $0x30] sm:$0xf]  ;;  %v1641_v31 = vld [vmem:[#allocation3 + $0x34] sm:$0x1]  ;;  %v1667_v14 = vld [vmem:[#allocation3 + $0x1c] sm:$0x1] }
 0x217   : > { %1634 = vst [vmem:[#allocation3 + $0x28] sm:$0xf] %v1633_v53  ;;  %v2331_v42 = vor.u32 %v2330_v10, %v2326_v43  ;;  %v2406_v37 = vunpack.c.l.b16 %v2278_v20  ;;  %v2303_v62 = vunpack.c.l.b16 %v3491_v59  ;;  %v1714_v1 = vpack.c.b16 %v1701_v52, %v1700_v48  ;;  %v1902_v52 = vld [vmem:[#allocation3 + $0x18] sm:$0xe] }
 0x218   : > { %1637 = vst [vmem:[#allocation3 + $0x2c] sm:$0x1] %v1636_v54  ;;  %v1568_v49 = vshrl.u32 %v1524_v29, 16  ;;  %v1482_v56 = vsel %vm3390_vm12, 0, %v1481_v3  ;;  %v1956_v19 = vshrl.u32 %v3474_v8, 16  ;;  %v1818_v28 = vrot.slane %v1810_v38, 1 }
 0x219   : > { %v2318_v0 = vpack.c.b16 %v2304_v25, %v2303_v62  ;;  %1483 = vst [vmem:[#allocation3 + $0x40] sm:$0x1] %v1482_v56  ;;  %v1514_v34 = vsel %vm3398_vm13, 0, %v1513_v21  ;;  %v1571_v5 = vshll.u32 %v1524_v29, 16  ;;  %v1120_v7 = vadd.f32 %v1119_v17, %v3387_v61  ;;  %v3510_v35 = vld [vmem:[#allocation3 + $0x18] sm:$0xf] }
 0x21a   : > { %2381 = vrot.lane.b32.xlu0 %v2331_v42, %s2842_s26  ;;  %v1570_v50 = vrot.slane %v1568_v49, 7  ;;  %1515 = vst [vmem:[#allocation3 + $0x44] sm:$0xf] %v1514_v34  ;;  %v1961_v57 = vor.u32 %v1960_v45, %v1956_v19  ;;  %v2414_v8 = vpack.c.b16 %v2304_v25, %v2406_v37  ;;  %v1929_v33 = vunpack.c.l.b16 %v1894_v58  ;;  %v1675_v23 = vld [vmem:[#allocation3 + $0x18] sm:$0xe] }
 0x21b   : > { %v2335_v12 = vshll.u32 %v2318_v0, 16  ;;  %v1737_v13 = vshll.u32 %v1714_v1, 16  ;;  %v1928_v61 = vunpack.c.l.b16 %v3506_v16  ;;  %v2030_v22 = vunpack.c.l.b16 %v1902_v52  ;;  %v2271_v62 = vld [vmem:[#allocation3 + $0x24] sm:$0x1]  ;;  %v3522_v49 = vld [vmem:[#allocation3 + $0x20] sm:$0xf] }
 0x21c   : > { %v1416_v30 = vpop.f32.mrf.mxu2  ;;  %v1573_v6 = vor.u32 %v1571_v5, %v1570_v50  ;;  %v1574_v4 = vrot.slane %v1570_v50, 4  ;;  %2006 = vrot.lane.b32.xlu2 %v1961_v57, %s2842_s26  ;;  %v2422_v27 = vrot.slane %v2414_v8, 1  ;;  %v1703_v41 = vunpack.c.l.b16 %v1667_v14  ;;  %v1895_v56 = vld [vmem:[#allocation3 + $0x24] sm:$0x1]  ;;  %v1644_v34 = vld [vmem:[#allocation3 + $0x38] sm:$0xf] }
 0x21d   : > { %1828 = vrot.lane.b32.xlu1 %v1818_v28, %s2843_s16  ;;  %v1427_v55 = vadd.f32 %v1416_v30, %v1120_v7  ;;  %v2337_v60 = vrot.slane %v2335_v12, 1  ;;  %v1121_v9 = vpop.f32.mrf.mxu3  ;;  %v1942_v20 = vpack.c.b16 %v1929_v33, %v1928_v61  ;;  %v1739_v43 = vrot.slane %v1737_v13, 1  ;;  %v1647_v50 = vld [vmem:[#allocation3 + $0x3c] sm:$0x1] }
 0x21e   : > { %v1639_v15 = vsel %vm3398_vm13, %v1573_v6, %v1638_v47  ;;  %v1642_v63 = vsel %vm3390_vm12, %v1574_v4, %v1641_v31  ;;  %v2333_v48 = vshrl.u32 %v2318_v0, 16  ;;  %v1702_v11 = vunpack.c.l.b16 %v3510_v35  ;;  %v1903_v0 = vld [vmem:[#allocation3 + $0x20] sm:$0xe] }
 0x21f   : > { %v1439_v26 = vadd.f32 %v3420_v24, %v1427_v55  ;;  %1640 = vst [vmem:[#allocation3 + $0x30] sm:$0xf] %v1639_v15  ;;  %v1735_v53 = vshrl.u32 %v1714_v1, 16  ;;  %v1803_v54 = vunpack.c.l.b16 %v1675_v23  ;;  %v1122_v10 = vadd.f32 %v1121_v9, %v3407_v39  ;;  %v3528_v55 = vld [vmem:[#allocation3 + $0x20] sm:$0xf] }
 0x220   : > { %1643 = vst [vmem:[#allocation3 + $0x34] sm:$0x1] %v1642_v63  ;;  %v2338_v38 = vor.u32 %v2337_v60, %v2333_v48  ;;  %v1965_v3 = vshll.u32 %v1942_v20, 16  ;;  %v2038_v45 = vpack.c.b16 %v1929_v33, %v2030_v22  ;;  %v1715_v21 = vpack.c.b16 %v1703_v41, %v1702_v11  ;;  %v2279_v33 = vld [vmem:[#allocation3 + $0x20] sm:$0xe] }
 0x221   : > { %v1447_v46 = vmax.f32 %v1439_v26, 0.0  ;;  %v1740_v25 = vor.u32 %v1739_v43, %v1735_v53  ;;  %v1811_v1 = vpack.c.b16 %v1703_v41, %v1803_v54  ;;  %v2306_v7 = vunpack.c.l.b16 %v2271_v62  ;;  %v1668_v22 = vld [vmem:[#allocation3 + $0x24] sm:$0x1]  ;;  %v1676_v41 = vld [vmem:[#allocation3 + $0x20] sm:$0xe] }
 0x222   : > { %2431 = vrot.lane.b32.xlu0 %v2422_v27, %s2843_s16  ;;  %v1967_v28 = vrot.slane %v1965_v3, 1  ;;  %v2046_v5 = vrot.slane %v2038_v45, 1  ;;  %v1744_v47 = vshll.u32 %v1715_v21, 16  ;;  %v2305_v31 = vunpack.c.l.b16 %v3522_v49  ;;  %v1650_v43 = vld [vmem:[#allocation3 + $0x40] sm:$0xf] }
 0x223   : > { %v1525_v17 = vpack.c.bf16 %v1447_v46, %v1447_v46  ;;  %v1963_v12 = vshrl.u32 %v1942_v20, 16  ;;  %v1931_v6 = vunpack.c.l.b16 %v1895_v56  ;;  %v2031_v4 = vunpack.c.l.b16 %v1903_v0  ;;  %v1653_v48 = vld [vmem:[#allocation3 + $0x44] sm:$0x1]  ;;  %v2272_v54 = vld [vmem:[#allocation3 + $0x2c] sm:$0x1] }
 0x224   : > { %v1418_v29 = vpop.f32.mrf.mxu2  ;;  %1780 = vrot.lane.b32.xlu2 %v1740_v25, %s2842_s26  ;;  %v1746_v61 = vrot.slane %v1744_v47, 1  ;;  %v2319_v15 = vpack.c.b16 %v2306_v7, %v2305_v31  ;;  %v1819_v26 = vrot.slane %v1811_v1, 1  ;;  %v2407_v60 = vunpack.c.l.b16 %v2279_v33  ;;  %v3540_v25 = vld [vmem:[#allocation3 + $0x20] sm:$0xf]  ;;  %v2280_v0 = vld [vmem:[#allocation3 + $0x28] sm:$0xe] }
 0x225   : > { %v1576_v42 = vshrl.u32 %v1525_v17, 16  ;;  %2383 = vrot.lane.b32.xlu1 %v2338_v38, %s2842_s26  ;;  %v1428_v37 = vadd.f32 %v1418_v29, %v1122_v10  ;;  %v1579_v19 = vshll.u32 %v1525_v17, 16  ;;  %v1968_v14 = vor.u32 %v1967_v28, %v1963_v12  ;;  %v3537_v17 = vld [vmem:[#allocation3 + $0x28] sm:$0xf]  ;;  %v1896_v31 = vld [vmem:[#allocation3 + $0x2c] sm:$0x1] }
 0x226   : > { %v1930_v23 = vunpack.c.l.b16 %v3528_v55  ;;  %v1742_v9 = vshrl.u32 %v1715_v21, 16  ;;  %v2039_v27 = vpack.c.b16 %v1931_v6, %v2031_v4  ;;  %v2342_v53 = vshll.u32 %v2319_v15, 16 }
 0x227   : > { %v1578_v58 = vrot.slane %v1576_v42, 7  ;;  %v1440_v39 = vadd.f32 %v3420_v24, %v1428_v37  ;;  %v2415_v3 = vpack.c.b16 %v2306_v7, %v2407_v60  ;;  %v1705_v21 = vunpack.c.l.b16 %v1668_v22 }
 0x228   : > { %v1747_v11 = vor.u32 %v1746_v61, %v1742_v9  ;;  %v1943_v29 = vpack.c.b16 %v1931_v6, %v1930_v23  ;;  %v2047_v45 = vrot.slane %v2039_v27, 1  ;;  %v1804_v42 = vunpack.c.l.b16 %v1676_v41 }
 0x229   : > { %v1581_v57 = vor.u32 %v1579_v19, %v1578_v58  ;;  %v1582_v30 = vrot.slane %v1578_v58, 4  ;;  %v1448_v8 = vmax.f32 %v1440_v39, 0.0  ;;  %v2308_v1 = vunpack.c.l.b16 %v2272_v54 }
 0x22a   : > { %2056 = vrot.lane.b32.xlu0 %v2046_v5, %s2843_s16  ;;  %v2307_v56 = vunpack.c.l.b16 %v3537_v17  ;;  %v2344_v58 = vrot.slane %v2342_v53, 1  ;;  %v2423_v19 = vrot.slane %v2415_v3, 1  ;;  %v1972_v39 = vshll.u32 %v1943_v29, 16  ;;  %v2273_v3 = vld [vmem:[#allocation3 + $0x34] sm:$0x1] }
 0x22b   : > { %v1645_v24 = vsel %vm3398_vm13, %v1581_v57, %v1644_v34  ;;  %v1648_v13 = vsel %vm3390_vm12, %v1582_v30, %v1647_v50  ;;  %v1526_v52 = vpack.c.bf16 %v1448_v8, %v1448_v8  ;;  %v1704_v28 = vunpack.c.l.b16 %v3540_v25  ;;  %v3550_v57 = vld [vmem:[#allocation3 + $0x28] sm:$0xf] }
 0x22c   : > { %1646 = vst [vmem:[#allocation3 + $0x38] sm:$0xf] %v1645_v24  ;;  %1830 = vrot.lane.b32.xlu2 %v1819_v26, %s2843_s16  ;;  %v2340_v34 = vshrl.u32 %v2319_v15, 16  ;;  %v1812_v50 = vpack.c.b16 %v1705_v21, %v1804_v42  ;;  %v2320_v5 = vpack.c.b16 %v2308_v1, %v2307_v56  ;;  %v2408_v47 = vunpack.c.l.b16 %v2280_v0  ;;  %v1669_v15 = vld [vmem:[#allocation3 + $0x2c] sm:$0x1] }
 0x22d   : > { %1649 = vst [vmem:[#allocation3 + $0x3c] sm:$0x1] %v1648_v13  ;;  %v1584_v63 = vshrl.u32 %v1526_v52, 16  ;;  %2008 = vrot.lane.b32.xlu1 %v1968_v14, %s2842_s26  ;;  %v1587_v46 = vshll.u32 %v1526_v52, 16  ;;  %v1974_v30 = vrot.slane %v1972_v39, 1  ;;  %v1716_v8 = vpack.c.b16 %v1705_v21, %v1704_v28 }
 0x22e   : > { %v2345_v7 = vor.u32 %v2344_v58, %v2340_v34  ;;  %v1970_v12 = vshrl.u32 %v1943_v29, 16  ;;  %v1820_v33 = vrot.slane %v1812_v50, 1  ;;  %v2349_v6 = vshll.u32 %v2320_v5, 16  ;;  %v1904_v52 = vld [vmem:[#allocation3 + $0x28] sm:$0xe] }
 0x22f   : > { %v1586_v20 = vrot.slane %v1584_v63, 7  ;;  %v1933_v4 = vunpack.c.l.b16 %v1896_v31  ;;  %v1932_v24 = vunpack.c.l.b16 %v3550_v57  ;;  %v2416_v13 = vpack.c.b16 %v2308_v1, %v2408_v47  ;;  %v3555_v63 = vld [vmem:[#allocation3 + $0x28] sm:$0xf]  ;;  %v3561_v29 = vld [vmem:[#allocation3 + $0x30] sm:$0xf] }
 0x230   : > { %v1975_v14 = vor.u32 %v1974_v30, %v1970_v12  ;;  %v1751_v61 = vshll.u32 %v1716_v8, 16  ;;  %v2351_v26 = vrot.slane %v2349_v6, 1  ;;  %v2032_v9 = vunpack.c.l.b16 %v1904_v52  ;;  %v1905_v1 = vld [vmem:[#allocation3 + $0x30] sm:$0xe] }
 0x231   : > { %v1589_v10 = vor.u32 %v1587_v46, %v1586_v20  ;;  %v1590_v38 = vrot.slane %v1586_v20, 4  ;;  %v1944_v60 = vpack.c.b16 %v1933_v4, %v1932_v24  ;;  %v2424_v23 = vrot.slane %v2416_v13, 1  ;;  %v1677_v46 = vld [vmem:[#allocation3 + $0x28] sm:$0xe]  ;;  %v2281_v39 = vld [vmem:[#allocation3 + $0x30] sm:$0xe] }
 0x232   : > { %1782 = vrot.lane.b32.xlu0 %v1747_v11, %s2842_s26  ;;  %v1707_v27 = vunpack.c.l.b16 %v1669_v15  ;;  %v1706_v22 = vunpack.c.l.b16 %v3555_v63  ;;  %v1753_v41 = vrot.slane %v1751_v61, 1  ;;  %v2347_v20 = vshrl.u32 %v2320_v5, 16  ;;  %v3566_v28 = vld [vmem:[#allocation3 + $0x30] sm:$0xf] }
 0x233   : > { %v1651_v37 = vsel %vm3398_vm13, %v1589_v10, %v1650_v43  ;;  %v1654_v62 = vsel %vm3390_vm12, %v1590_v38, %v1653_v48  ;;  %v1749_v43 = vshrl.u32 %v1716_v8, 16  ;;  %v1979_v11 = vshll.u32 %v1944_v60, 16  ;;  %v1678_v6 = vld [vmem:[#allocation3 + $0x30] sm:$0xe]  ;;  %v3571_v52 = vld [vmem:[#allocation3 + $0x38] sm:$0xf] }
 0x234   : > { %1652 = vst [vmem:[#allocation3 + $0x40] sm:$0xf] %v1651_v37  ;;  %2433 = vrot.lane.b32.xlu2 %v2423_v19, %s2843_s16  ;;  %v2352_v48 = vor.u32 %v2351_v26, %v2347_v20  ;;  %v2040_v53 = vpack.c.b16 %v1933_v4, %v2032_v9  ;;  %v1717_v54 = vpack.c.b16 %v1707_v27, %v1706_v22  ;;  %v1805_v38 = vunpack.c.l.b16 %v1677_v46  ;;  %v2274_v13 = vld [vmem:[#allocation3 + $0x3c] sm:$0x1]  ;;  %v3574_v26 = vld [vmem:[#allocation3 + $0x30] sm:$0xf] }
 0x235   : > { %1655 = vst [vmem:[#allocation3 + $0x44] sm:$0x1] %v1654_v62  ;;  %2058 = vrot.lane.b32.xlu1 %v2047_v45, %s2843_s16  ;;  %v1754_v10 = vor.u32 %v1753_v41, %v1749_v43  ;;  %v1981_v45 = vrot.slane %v1979_v11, 1  ;;  %v2310_v37 = vunpack.c.l.b16 %v2273_v3  ;;  %v1897_v62 = vld [vmem:[#allocation3 + $0x34] sm:$0x1]  ;;  %v2309_v56 = vunpack.c.l.b16 %v3561_v29 }
 0x236   : > { %v2048_v21 = vrot.slane %v2040_v53, 1  ;;  %v1758_v42 = vshll.u32 %v1717_v54, 16  ;;  %v1813_v58 = vpack.c.b16 %v1707_v27, %v1805_v38  ;;  %v1977_v19 = vshrl.u32 %v1944_v60, 16  ;;  %v2282_v43 = vld [vmem:[#allocation3 + $0x38] sm:$0xe] }
 0x237   : > { %v1935_v34 = vunpack.c.l.b16 %v1897_v62  ;;  %v2033_v50 = vunpack.c.l.b16 %v1905_v1  ;;  %v2409_v31 = vunpack.c.l.b16 %v2281_v39  ;;  %v1934_v30 = vunpack.c.l.b16 %v3566_v28  ;;  %v1898_v38 = vld [vmem:[#allocation3 + $0x3c] sm:$0x1]  ;;  %v3580_v3 = vld [vmem:[#allocation3 + $0x38] sm:$0xf] }
 0x238   : > { %v1982_v0 = vor.u32 %v1981_v45, %v1977_v19  ;;  %v1760_v5 = vrot.slane %v1758_v42, 1  ;;  %v1821_v47 = vrot.slane %v1813_v58, 1  ;;  %v1756_v8 = vshrl.u32 %v1717_v54, 16  ;;  %v1906_v58 = vld [vmem:[#allocation3 + $0x38] sm:$0xe] }
 0x239   : > { %v2041_v12 = vpack.c.b16 %v1935_v34, %v2033_v50  ;;  %v1945_v61 = vpack.c.b16 %v1935_v34, %v1934_v30  ;;  %v2312_v9 = vunpack.c.l.b16 %v2274_v13  ;;  %v2311_v27 = vunpack.c.l.b16 %v3571_v52 }
 0x23a   : > { %2385 = vrot.lane.b32.xlu0 %v2345_v7, %s2842_s26  ;;  %v2321_v7 = vpack.c.b16 %v2310_v37, %v2309_v56  ;;  %v1761_v4 = vor.u32 %v1760_v5, %v1756_v8  ;;  %v1708_v46 = vunpack.c.l.b16 %v3574_v26  ;;  %v1937_v19 = vunpack.c.l.b16 %v1898_v38 }
 0x23b   : > { %v2049_v60 = vrot.slane %v2041_v12, 1  ;;  %v1986_v20 = vshll.u32 %v1945_v61, 16  ;;  %v2322_v53 = vpack.c.b16 %v2312_v9, %v2311_v27  ;;  %v1984_v42 = vshrl.u32 %v1945_v61, 16 }
 0x23c   : > { %2010 = vrot.lane.b32.xlu2 %v1975_v14, %s2842_s26  ;;  %v2356_v24 = vshll.u32 %v2321_v7, 16  ;;  %v2417_v14 = vpack.c.b16 %v2310_v37, %v2409_v31  ;;  %v3583_v37 = vld [vmem:[#allocation3 + $0x40] sm:$0xf]  ;;  %v3585_v62 = vld [vmem:[#allocation3 + $0x44] sm:$0x1]  ;;  %v1936_v39 = vunpack.c.l.b16 %v3580_v3  ;;  %v2034_v30 = vunpack.c.l.b16 %v1906_v58 }
 0x23d   : > { %1832 = vrot.lane.b32.xlu1 %v1820_v33, %s2843_s16  ;;  %v1670_v33 = vld [vmem:[#allocation3 + $0x34] sm:$0x1]  ;;  %v1988_v45 = vrot.slane %v1986_v20, 1  ;;  %v2363_v56 = vshll.u32 %v2322_v53, 16  ;;  %v1938_v5 = vunpack.c.l.b16 %v3583_v37  ;;  %v3593_v31 = vld [vmem:[#allocation3 + $0x3c] sm:$0x1] }
 0x23e   : > { %v1709_v15 = vunpack.c.l.b16 %v1670_v33  ;;  %v2358_v22 = vrot.slane %v2356_v24, 1  ;;  %v2425_v41 = vrot.slane %v2417_v14, 1  ;;  %v1946_v12 = vpack.c.b16 %v1937_v19, %v1936_v39  ;;  %v3615_v2 = vld [vmem:[#allocation3 + $0x44] sm:$0x1] }
 0x23f   : > { %v1989_v34 = vor.u32 %v1988_v45, %v1984_v42  ;;  %v2365_v8 = vrot.slane %v2363_v56, 1  ;;  %v2361_v14 = vshrl.u32 %v2322_v53, 16 }
 0x240   : > { %v1991_v39 = vshrl.u32 %v1946_v12, 16 }
 0x241   : > { %v2366_v27 = vor.u32 %v2365_v8, %v2361_v14 }
 0x242   : > { %2435 = vrot.lane.b32.xlu0 %v2424_v23, %s2843_s16  ;;  %v1806_v23 = vunpack.c.l.b16 %v1678_v6 }
 0x244   : > { %1784 = vrot.lane.b32.xlu2 %v1754_v10, %s2842_s26  ;;  %v1814_v11 = vpack.c.b16 %v1709_v15, %v1806_v23  ;;  %v2410_v10 = vunpack.c.l.b16 %v2282_v43  ;;  %v1484_v23 = vld [vmem:[#allocation3 + $0x48] sm:$0x1] }
 0x245   : > { %2387 = vrot.lane.b32.xlu1 %v2352_v48, %s2842_s26  ;;  %v2354_v48 = vshrl.u32 %v2321_v7, 16  ;;  %v1939_v7 = vunpack.c.l.b16 %v3585_v62  ;;  %v2284_v62 = vld [vmem:[#allocation3 + $0x48] sm:$0xe] }
 0x246   : > { %v1822_v1 = vrot.slane %v1814_v11, 1 }
 0x247   : > { %v2359_v54 = vor.u32 %v2358_v22, %v2354_v48  ;;  %v1947_v61 = vpack.c.b16 %v1939_v7, %v1938_v5  ;;  %v1993_v22 = vshll.u32 %v1946_v12, 16  ;;  %v3612_v48 = vld [vmem:[#allocation3 + $0x40] sm:$0xf] }
 0x248   : > { %v2313_v42 = vunpack.c.l.b16 %v3612_v48 }
 0x249   : > { %v1995_v38 = vrot.slane %v1993_v22, 1 }
 0x24a   : > { %2060 = vrot.lane.b32.xlu0 %v2048_v21, %s2843_s16  ;;  %v1718_v21 = vpack.c.b16 %v1709_v15, %v1708_v46  ;;  %v1883_v46 = vld [vmem:[%s3758_s3 + $0x8] sm:$0xf] }
 0x24b   : > { %v2212_v11 = vunpack.c.l.b16 %v1883_v46  ;;  %v1996_v8 = vor.u32 %v1995_v38, %v1991_v39  ;;  %v2750_v46 = vld [vmem:[%s3758_s3 + $0xc] sm:$0xff]  ;;  %v2412_v39 = vunpack.c.l.b16 %v2284_v62 }
 0x24c   : > { %1834 = vrot.lane.b32.xlu2 %v1821_v47, %s2843_s16  ;;  %v1765_v50 = vshll.u32 %v1718_v21, 16  ;;  %v3591_v47 = vld [vmem:[#allocation3 + $0x38] sm:$0xf]  ;;  %v1763_v15 = vshrl.u32 %v1718_v21, 16  ;;  %v1907_v21 = vld [vmem:[#allocation3 + $0x40] sm:$0xe] }
 0x24d   : > { %2012 = vrot.lane.b32.xlu1 %v1982_v0, %s2842_s26  ;;  %v2418_v0 = vpack.c.b16 %v2312_v9, %v2410_v10  ;;  %v1710_v6 = vunpack.c.l.b16 %v3591_v47  ;;  %v1516_v9 = vld [vmem:[#allocation3 + $0x4c] sm:$0xf]  ;;  %v2214_v51 = vpack.c.b16 %v2212_v11, %v2212_v11 }
 0x24e   : > { %v1767_v13 = vrot.slane %v1765_v50, 1  ;;  %v1517_v20 = vsel %vm3398_vm13, 0, %v1516_v9  ;;  %v1679_v50 = vld [vmem:[#allocation3 + $0x38] sm:$0xe] }
 0x24f   : > { %v2426_v33 = vrot.slane %v2418_v0, 1  ;;  %1518 = vst [vmem:[#allocation3 + $0x4c] sm:$0xf] %v1517_v20  ;;  %v2229_v56 = vsel %vm2154_vm14, %v2214_v51, 0  ;;  %v2715_v0 = vld [vmem:[%s3758_s3 + $0x14] sm:$0xf]  ;;  %v1807_v9 = vunpack.c.l.b16 %v1679_v50 }
 0x250   : > { %v1768_v53 = vor.u32 %v1767_v13, %v1763_v15  ;;  %2237 = vmatpush.bf16.msrb.mxu0 %v2229_v56  ;;  %v2137_v5 = vunpack.c.l.b16 %v2715_v0  ;;  %v2283_v51 = vld [vmem:[#allocation3 + $0x40] sm:$0xe] }
 0x252   : > { %1786 = vrot.lane.b32.xlu0 %v1761_v4, %s2842_s26  ;;  %v1711_v4 = vunpack.c.l.b16 %v3593_v31 }
 0x254   : > { %2437 = vrot.lane.b32.xlu2 %v2425_v41, %s2843_s16  ;;  %v1485_v41 = vsel %vm3390_vm12, 0, %v1484_v23  ;;  %v1719_v43 = vpack.c.b16 %v1711_v4, %v1710_v6 }
 0x255   : > { %2062 = vrot.lane.b32.xlu1 %v2049_v60, %s2843_s16  ;;  %v3598_v24 = vpop.permute.xlu2 %1776  ;;  %v2042_v60 = vpack.c.b16 %v1937_v19, %v2034_v30  ;;  %1486 = vst [vmem:[#allocation3 + $0x48] sm:$0x1] %v1485_v41  ;;  %v1998_v30 = vshrl.u32 %v1947_v61, 16 }
 0x256   : > { %v1772_v45 = vshll.u32 %v1719_v43, 16  ;;  %v2276_v14 = vld [vmem:[#allocation3 + $0x4c] sm:$0x1]  ;;  %v1770_v22 = vshrl.u32 %v1719_v43, 16  ;;  %v1815_v43 = vpack.c.b16 %v1711_v4, %v1807_v9 }
 0x257   : > { %v2050_v10 = vrot.slane %v2042_v60, 1  ;;  %v2139_v60 = vpack.c.b16 %v2137_v5, %v2137_v5  ;;  %v2734_v5 = vld [vmem:[%s3758_s3 + $0x20] sm:$0xf] }
 0x258   : > { %v1774_v13 = vrot.slane %v1772_v45, 1  ;;  %v1823_v38 = vrot.slane %v1815_v43, 1 }
 0x259   : > { %v2156_v41 = vsel %vm2154_vm14, %v2139_v60, 0 }
 0x25a   : > { %2389 = vrot.lane.b32.xlu0 %v2359_v54, %s2842_s26  ;;  %v2000_v54 = vshll.u32 %v1947_v61, 16  ;;  %2164 = vmatpush.bf16.msrb.mxu3 %v2156_v41  ;;  %v1775_v11 = vor.u32 %v1774_v13, %v1770_v22 }
 0x25c   : > { %2014 = vrot.lane.b32.xlu2 %v1989_v34, %s2842_s26  ;;  %v2002_v19 = vrot.slane %v2000_v54, 1  ;;  %v2749_v34 = vld [vmem:[%s3758_s3] sm:$0xff]  ;;  %v3630_v6 = vld [vmem:[#allocation3 + $0x48] sm:$0xf] }
 0x25d   : > { %1836 = vrot.lane.b32.xlu1 %v1822_v1, %s2843_s16  ;;  %v2314_v1 = vunpack.c.l.b16 %v3615_v2  ;;  %v2315_v15 = vunpack.c.l.b16 %v3630_v6  ;;  %2238 = vmatpush.bf16.msrb.mxu0 %v2749_v34 }
 0x25e   : > { %v2003_v23 = vor.u32 %v2002_v19, %v1998_v30  ;;  %2165 = vmatpush.bf16.msrb.mxu3 %v2750_v46 }
 0x25f   : > { %v2323_v12 = vpack.c.b16 %v2314_v1, %v2313_v42 }
 0x261   : > { %v1825_v45 = vpop.permute.xlu1 %1824  ;;  %v2368_v19 = vshrl.u32 %v2323_v12, 16 }
 0x262   : > { %2439 = vrot.lane.b32.xlu0 %v2426_v33, %s2843_s16  ;;  %v2035_v33 = vunpack.c.l.b16 %v1907_v21  ;;  %v2411_v21 = vunpack.c.l.b16 %v2283_v51 }
 0x264   : > { %1788 = vrot.lane.b32.xlu2 %v1768_v53, %s2842_s26  ;;  %v2043_v61 = vpack.c.b16 %v1939_v7, %v2035_v33  ;;  %v2370_v53 = vshll.u32 %v2323_v12, 16  ;;  %v2419_v0 = vpack.c.b16 %v2314_v1, %v2411_v21 }
 0x265   : > { %2391 = vrot.lane.b32.xlu1 %v2366_v27, %s2842_s26  ;;  %v3621_v58 = vpop.permute.xlu2 %1826  ;;  %v2316_v27 = vunpack.c.l.b16 %v2276_v14 }
 0x266   : > { %v2372_v7 = vrot.slane %v2370_v53, 1  ;;  %v2427_v33 = vrot.slane %v2419_v0, 1 }
 0x267   : > { %v2324_v20 = vpack.c.b16 %v2316_v27, %v2315_v15  ;;  %v2420_v50 = vpack.c.b16 %v2316_v27, %v2412_v39  ;;  %v2830_v15 = vld [vmem:[#allocation3] sm:$0xf] }
 0x268   : > { %v2373_v31 = vor.u32 %v2372_v7, %v2368_v19  ;;  %v1842_v60 = vsel %vm738_vm8, %v2830_v15, %v3598_v24 }
 0x269   : > { %v2377_v2 = vshll.u32 %v2324_v20, 16  ;;  %v2375_v42 = vshrl.u32 %v2324_v20, 16  ;;  %v2428_v12 = vrot.slane %v2420_v50, 1  ;;  %v1866_v27 = vsel %vm1864_vm15, %v1842_v60, %v1825_v45 }
 0x26a   : > { %2064 = vrot.lane.b32.xlu0 %v2050_v10, %s2843_s16  ;;  %v2051_v10 = vrot.slane %v2043_v61, 1  ;;  %v2195_v20 = vunpack.c.l.b16 %v1866_v27 }
 0x26b   : > { %v2379_v56 = vrot.slane %v2377_v2, 1 }
 0x26c   : > { %2018 = vrot.lane.b32.xlu2 %v2003_v23, %s2842_s26  ;;  %v2751_v23 = vld [vmem:[%s3758_s3 + $0x18] sm:$0xff] }
 0x26d   : > { %2016 = vrot.lane.b32.xlu1 %v1996_v8, %s2842_s26  ;;  %v3641_v54 = vpop.permute.xlu2 %2429  ;;  %v2380_v34 = vor.u32 %v2379_v56, %v2375_v42  ;;  %v2514_v8 = vunpack.c.l.b16 %v2734_v5 }
 0x26f   : > { %v2516_v13 = vpack.c.b16 %v2514_v8, %v2514_v8 }
 0x271   : > { %v2531_v1 = vsel %vm2154_vm14, %v2516_v13, 0 }
 0x272   : > { %1790 = vrot.lane.b32.xlu0 %v1775_v11, %s2842_s26  ;;  %2539 = vmatpush.bf16.msrb.mxu1 %v2531_v1 }
 0x274   : > { %1838 = vrot.lane.b32.xlu2 %v1823_v38, %s2843_s16 }
 0x275   : > { %2066 = vrot.lane.b32.xlu1 %v2051_v10, %s2843_s16 }
 0x276   : > { %v2007_v4 = vpop.permute.xlu2 %2006  ;;  %2540 = vmatpush.bf16.msrb.mxu1 %v2751_v23 }
 0x277   : > { %v2073_v53 = vsel %vm738_vm8, %v3463_v18, %v2007_v4 }
 0x27a   : > { %2393 = vrot.lane.b32.xlu0 %v2373_v31, %s2842_s26 }
 0x27b   : > { %v2053_v30 = vpop.permute.xlu0 %2052 }
 0x27c   : > { %2441 = vrot.lane.b32.xlu2 %v2427_v33, %s2843_s16 }
 0x27d   : > { %2395 = vrot.lane.b32.xlu1 %v2380_v34, %s2842_s26 }
 0x27e   : > { %v1781_v9 = vpop.permute.xlu2 %1780 }
 0x27f   : > { %v2005_v14 = vpop.permute.xlu1 %2004 }
 0x280   : > { %v2070_v22 = vsel %vm738_vm8, %v3449_v44, %v2005_v14 }
 0x281   : > { %v2093_v46 = vsel %vm1864_vm15, %v2070_v22, %v2053_v30 }
 0x282   : > { %2443 = vrot.lane.b32.xlu0 %v2428_v12, %s2843_s16  ;;  %v2120_v51 = vunpack.c.l.b16 %v2093_v46 }
 0x284   : > { %v1779_v41 = vpop.permute.xlu0 %1778 }
 0x285   : > { %v1845_v61 = vsel %vm738_vm8, %v3454_v40, %v1779_v41 }
 0x286   : > { %v1868_v24 = vsel %vm1864_vm15, %v1845_v61, %v3621_v58  ;;  %v1831_v10 = vpop.permute.xlu2 %1830 }
 0x287   : > { %v2196_v11 = vunpack.c.l.b16 %v1868_v24  ;;  %v2055_v43 = vpop.permute.xlu1 %2054 }
 0x288   : > { %v2095_v44 = vsel %vm1864_vm15, %v2073_v53, %v2055_v43 }
 0x289   : > { %v2203_v2 = vpack.c.b16 %v2196_v11, %v2195_v20  ;;  %v2121_v62 = vunpack.c.l.b16 %v2095_v44 }
 0x28b   : > { %2728 = vmatmul.msk.bf16.vlgmr.msrb.gmra.mxu0 %vm2141_vm0, %v2203_v2  ;;  %v2128_v40 = vpack.c.b16 %v2121_v62, %v2120_v51 }
 0x28c   : > { %v2382_v7 = vpop.permute.xlu0 %2381 }
 0x28d   : > { %2720 = vmatmul.msk.bf16.vlgmr.msrb.gmra.mxu3 %vm2141_vm0, %v2128_v40  ;;  %v2447_v45 = vsel %vm738_vm8, %v3467_v36, %v2382_v7  ;;  %v1848_v36 = vsel %vm738_vm8, %v3483_v32, %v1781_v9 }
 0x28e   : > { %v2434_v38 = vpop.permute.xlu2 %2433  ;;  %v2470_v21 = vsel %vm1864_vm15, %v2447_v45, %v3641_v54 }
 0x28f   : > { %v1829_v58 = vpop.permute.xlu1 %1828  ;;  %v2497_v39 = vunpack.c.l.b16 %v2470_v21 }
 0x290   : > { %v1870_v5 = vsel %vm1864_vm15, %v1848_v36, %v1829_v58 }
 0x291   : > { %v2197_v12 = vunpack.c.l.b16 %v1870_v5 }
 0x294   : > { %v2432_v18 = vpop.permute.xlu0 %2431 }
 0x296   : > { %v2011_v4 = vpop.permute.xlu2 %2010 }
 0x297   : > { %v2384_v42 = vpop.permute.xlu1 %2383  ;;  %v2079_v14 = vsel %vm738_vm8, %v3528_v55, %v2011_v4 }
 0x298   : > { %v2450_v56 = vsel %vm738_vm8, %v3491_v59, %v2384_v42 }
 0x299   : > { %v2472_v19 = vsel %vm1864_vm15, %v2450_v56, %v2432_v18 }
 0x29a   : > { %v2498_v31 = vunpack.c.l.b16 %v2472_v19 }
 0x29c   : > { %v2505_v0 = vpack.c.b16 %v2498_v31, %v2497_v39  ;;  %v2057_v34 = vpop.permute.xlu0 %2056 }
 0x29e   : > { %2739 = vmatmul.msk.bf16.vlgmr.msrb.gmra.mxu1 %vm2141_vm0, %v2505_v0  ;;  %v1785_v8 = vpop.permute.xlu2 %1784 }
 0x29f   : > { %v2009_v50 = vpop.permute.xlu1 %2008 }
 0x2a0   : > { %v2076_v54 = vsel %vm738_vm8, %v3506_v16, %v2009_v50 }
 0x2a1   : > { %v2097_v33 = vsel %vm1864_vm15, %v2076_v54, %v2057_v34 }
 0x2a2   : > { %v2122_v16 = vunpack.c.l.b16 %v2097_v33 }
 0x2a4   : > { %v1783_v30 = vpop.permute.xlu0 %1782 }
 0x2a5   : > { %v1851_v59 = vsel %vm738_vm8, %v3510_v35, %v1783_v30 }
 0x2a6   : > { %v1872_v13 = vsel %vm1864_vm15, %v1851_v59, %v1831_v10  ;;  %v1835_v22 = vpop.permute.xlu2 %1834 }
 0x2a7   : > { %v2198_v1 = vunpack.c.l.b16 %v1872_v13  ;;  %v2059_v32 = vpop.permute.xlu1 %2058 }
 0x2a8   : > { %v2099_v15 = vsel %vm1864_vm15, %v2079_v14, %v2059_v32 }
 0x2a9   : > { %v2123_v60 = vunpack.c.l.b16 %v2099_v15  ;;  %v2204_v23 = vpack.c.b16 %v2198_v1, %v2197_v12 }
 0x2ab   : > { %2729 = vmatmul.msk.bf16.gmra.mxu0 %vm2141_vm0, %v2204_v23  ;;  %v2129_v9 = vpack.c.b16 %v2123_v60, %v2122_v16 }
 0x2ac   : > { %v2386_v35 = vpop.permute.xlu0 %2385 }
 0x2ad   : > { %2721 = vmatmul.msk.bf16.gmra.mxu3 %vm2141_vm0, %v2129_v9  ;;  %v2453_v41 = vsel %vm738_vm8, %v3522_v49, %v2386_v35  ;;  %v1854_v49 = vsel %vm738_vm8, %v3540_v25, %v1785_v8 }
 0x2ae   : > { %v2474_v55 = vsel %vm1864_vm15, %v2453_v41, %v2434_v38  ;;  %v2438_v53 = vpop.permute.xlu2 %2437 }
 0x2af   : > { %v1833_v27 = vpop.permute.xlu1 %1832  ;;  %v2499_v11 = vunpack.c.l.b16 %v2474_v55 }
 0x2b0   : > { %v1874_v62 = vsel %vm1864_vm15, %v1854_v49, %v1833_v27 }
 0x2b1   : > { %v2199_v45 = vunpack.c.l.b16 %v1874_v62 }
 0x2b4   : > { %v2436_v61 = vpop.permute.xlu0 %2435 }
 0x2b6   : > { %v2015_v40 = vpop.permute.xlu2 %2014 }
 0x2b7   : > { %v2388_v24 = vpop.permute.xlu1 %2387  ;;  %v2085_v18 = vsel %vm738_vm8, %v3566_v28, %v2015_v40 }
 0x2b8   : > { %v2456_v20 = vsel %vm738_vm8, %v3537_v17, %v2388_v24 }
 0x2b9   : > { %v2476_v46 = vsel %vm1864_vm15, %v2456_v20, %v2436_v61 }
 0x2ba   : > { %v2500_v43 = vunpack.c.l.b16 %v2476_v46 }
 0x2bc   : > { %v2061_v2 = vpop.permute.xlu0 %2060  ;;  %v2506_v44 = vpack.c.b16 %v2500_v43, %v2499_v11 }
 0x2be   : > { %2740 = vmatmul.msk.bf16.gmra.mxu1 %vm2141_vm0, %v2506_v44  ;;  %v1789_v4 = vpop.permute.xlu2 %1788 }
 0x2bf   : > { %v2013_v51 = vpop.permute.xlu1 %2012 }
 0x2c0   : > { %v2082_v10 = vsel %vm738_vm8, %v3550_v57, %v2013_v51 }
 0x2c1   : > { %v2101_v58 = vsel %vm1864_vm15, %v2082_v10, %v2061_v2 }
 0x2c2   : > { %v2124_v57 = vunpack.c.l.b16 %v2101_v58 }
 0x2c4   : > { %v1787_v17 = vpop.permute.xlu0 %1786 }
 0x2c5   : > { %v1857_v7 = vsel %vm738_vm8, %v3555_v63, %v1787_v17 }
 0x2c6   : > { %v1876_v38 = vsel %vm1864_vm15, %v1857_v7, %v1835_v22  ;;  %v2019_v59 = vpop.permute.xlu2 %2018 }
 0x2c7   : > { %v2200_v21 = vunpack.c.l.b16 %v1876_v38  ;;  %v2063_v25 = vpop.permute.xlu1 %2062  ;;  %v2091_v60 = vsel %vm738_vm8, %v3583_v37, %v2019_v59 }
 0x2c8   : > { %v2103_v42 = vsel %vm1864_vm15, %v2085_v18, %v2063_v25 }
 0x2c9   : > { %v2125_v56 = vunpack.c.l.b16 %v2103_v42  ;;  %v2205_v19 = vpack.c.b16 %v2200_v21, %v2199_v45 }
 0x2cb   : > { %2730 = vmatmul.msk.bf16.gmra.mxu0 %vm2141_vm0, %v2205_v19  ;;  %v2130_v39 = vpack.c.b16 %v2125_v56, %v2124_v57 }
 0x2cc   : > { %v2390_v31 = vpop.permute.xlu0 %2389 }
 0x2cd   : > { %2722 = vmatmul.msk.bf16.gmra.mxu3 %vm2141_vm0, %v2130_v39  ;;  %v2459_v0 = vsel %vm738_vm8, %v3561_v29, %v2390_v31  ;;  %v1860_v29 = vsel %vm738_vm8, %v3574_v26, %v1789_v4 }
 0x2ce   : > { %v2478_v28 = vsel %vm1864_vm15, %v2459_v0, %v2438_v53 }
 0x2cf   : > { %v1837_v63 = vpop.permute.xlu1 %1836  ;;  %v2501_v5 = vunpack.c.l.b16 %v2478_v28 }
 0x2d0   : > { %v1878_v14 = vsel %vm1864_vm15, %v1860_v29, %v1837_v63 }
 0x2d1   : > { %v2201_v23 = vunpack.c.l.b16 %v1878_v14 }
 0x2d4   : > { %v2440_v34 = vpop.permute.xlu0 %2439 }
 0x2d7   : > { %v2392_v50 = vpop.permute.xlu1 %2391 }
 0x2d8   : > { %v2462_v36 = vsel %vm738_vm8, %v3571_v52, %v2392_v50  ;;  %v1839_v52 = vpop.permute.xlu2 %1838 }
 0x2d9   : > { %v2480_v54 = vsel %vm1864_vm15, %v2462_v36, %v2440_v34 }
 0x2da   : > { %v2502_v30 = vunpack.c.l.b16 %v2480_v54 }
 0x2dc   : > { %v2065_v8 = vpop.permute.xlu0 %2064  ;;  %v2507_v33 = vpack.c.b16 %v2502_v30, %v2501_v5 }
 0x2de   : > { %2741 = vmatmul.msk.bf16.gmra.mxu1 %vm2141_vm0, %v2507_v33 }
 0x2df   : > { %v2017_v13 = vpop.permute.xlu1 %2016 }
 0x2e0   : > { %v2088_v12 = vsel %vm738_vm8, %v3580_v3, %v2017_v13  ;;  %v2442_v24 = vpop.permute.xlu2 %2441 }
 0x2e1   : > { %v2105_v15 = vsel %vm1864_vm15, %v2088_v12, %v2065_v8 }
 0x2e2   : > { %v2126_v3 = vunpack.c.l.b16 %v2105_v15 }
 0x2e4   : > { %v1791_v1 = vpop.permute.xlu0 %1790 }
 0x2e5   : > { %v1863_v32 = vsel %vm738_vm8, %v3591_v47, %v1791_v1 }
 0x2e6   : > { %v1880_v16 = vsel %vm1864_vm15, %v1863_v32, %v1839_v52 }
 0x2e7   : > { %v2202_v9 = vunpack.c.l.b16 %v1880_v16  ;;  %v2067_v26 = vpop.permute.xlu1 %2066 }
 0x2e8   : > { %v2107_v35 = vsel %vm1864_vm15, %v2091_v60, %v2067_v26 }
 0x2e9   : > { %v2127_v27 = vunpack.c.l.b16 %v2107_v35  ;;  %v2206_v22 = vpack.c.b16 %v2202_v9, %v2201_v23 }
 0x2eb   : > { %2731 = vmatmul.msk.bf16.gmra.mxu0 %vm2141_vm0, %v2206_v22  ;;  %v2131_v41 = vpack.c.b16 %v2127_v27, %v2126_v3 }
 0x2ec   : > { %v2394_v61 = vpop.permute.xlu0 %2393 }
 0x2ed   : > { %2723 = vmatmul.msk.bf16.gmra.mxu3 %vm2141_vm0, %v2131_v41  ;;  %v2465_v55 = vsel %vm738_vm8, %v3612_v48, %v2394_v61  ;;  %v2828_v48 = vld [vmem:[%s3759_s4] ss:$0 sm:$0xff] }
 0x2ee   : > { %v2482_v20 = vsel %vm1864_vm15, %v2465_v55, %v2442_v24 }
 0x2ef   : > { %v2396_v47 = vpop.permute.xlu1 %2395  ;;  %v2503_v53 = vunpack.c.l.b16 %v2482_v20 }
 0x2f0   : > { %v2468_v37 = vsel %vm738_vm8, %v3630_v6, %v2396_v47 }
 0x2f4   : > { %v2444_v46 = vpop.permute.xlu0 %2443 }
 0x2f5   : > { %v2484_v11 = vsel %vm1864_vm15, %v2468_v37, %v2444_v46 }
 0x2f6   : > { %v2504_v43 = vunpack.c.l.b16 %v2484_v11 }
 0x2f8   : > { %v2508_v2 = vpack.c.b16 %v2504_v43, %v2503_v53 }
 0x2fa   : > { %2742 = vmatmul.msk.bf16.gmra.mxu1 %vm2141_vm0, %v2508_v2 }
 0x308   : > { %v2240_v51 = vpop.f32.mrf.mxu0 }
 0x310   : > { %v2167_v44 = vpop.f32.mrf.mxu3  ;;  %v2242_v7 = vpop.f32.mrf.mxu0 }
 0x311   : > { %v2241_v49 = vadd.f32 %v2240_v51, %v2167_v44 }
 0x318   : > { %v2169_v40 = vpop.f32.mrf.mxu3 }
 0x319   : > { %v2243_v58 = vadd.f32 %v2242_v7, %v2169_v40 }
 0x31b   : > { %v2542_v10 = vpop.f32.mrf.mxu1 }
 0x31c   : > { %v2562_v62 = vadd.f32 %v2542_v10, %v2241_v49 }
 0x31e   : > { %v2574_v6 = vadd.f32 %v2828_v48, %v2562_v62 }
 0x320   : > { %v2582_v17 = vmax.f32 %v2574_v6, 0.0 }
 0x322   : > { %2590 = vxpose.xlu1.b32.start [1/8] (short) (narrow) %v2582_v17, 8 }
 0x323   : > { %v2544_v38 = vpop.f32.mrf.mxu1 }
 0x324   : > { %v2563_v45 = vadd.f32 %v2544_v38, %v2243_v58 }
 0x326   : > { %v2575_v18 = vadd.f32 %v2828_v48, %v2563_v45 }
 0x328   : > { %v2583_v21 = vmax.f32 %v2575_v18, 0.0  ;;  %v2245_v42 = vpop.f32.mrf.mxu0 }
 0x32a   : > { %2591 = vxpose.xlu1.b32.cont [2/8] (short) (narrow) %v2583_v21, 8 }
 0x330   : > { %v2172_v25 = vpop.f32.mrf.mxu3  ;;  %v2247_v4 = vpop.f32.mrf.mxu0 }
 0x331   : > { %v2246_v57 = vadd.f32 %v2245_v42, %v2172_v25 }
 0x338   : > { %v2174_v31 = vpop.f32.mrf.mxu3 }
 0x339   : > { %v2248_v0 = vadd.f32 %v2247_v4, %v2174_v31 }
 0x33b   : > { %v2547_v56 = vpop.f32.mrf.mxu1 }
 0x33c   : > { %v2564_v19 = vadd.f32 %v2547_v56, %v2246_v57 }
 0x33e   : > { %v2576_v39 = vadd.f32 %v2828_v48, %v2564_v19 }
 0x340   : > { %v2584_v63 = vmax.f32 %v2576_v39, 0.0 }
 0x342   : > { %2592 = vxpose.xlu1.b32.cont [3/8] (short) (narrow) %v2584_v63, 8 }
 0x343   : > { %v2549_v34 = vpop.f32.mrf.mxu1 }
 0x344   : > { %v2565_v28 = vadd.f32 %v2549_v34, %v2248_v0 }
 0x346   : > { %v2577_v50 = vadd.f32 %v2828_v48, %v2565_v28 }
 0x348   : > { %v2585_v36 = vmax.f32 %v2577_v50, 0.0  ;;  %v2250_v5 = vpop.f32.mrf.mxu0 }
 0x34a   : > { %2593 = vxpose.xlu1.b32.cont [4/8] (short) (narrow) %v2585_v36, 8 }
 0x350   : > { %v2177_v54 = vpop.f32.mrf.mxu3  ;;  %v2252_v12 = vpop.f32.mrf.mxu0 }
 0x351   : > { %v2251_v30 = vadd.f32 %v2250_v5, %v2177_v54 }
 0x358   : > { %v2179_v13 = vpop.f32.mrf.mxu3 }
 0x359   : > { %v2253_v14 = vadd.f32 %v2252_v12, %v2179_v13 }
 0x35b   : > { %v2552_v59 = vpop.f32.mrf.mxu1 }
 0x35c   : > { %v2566_v8 = vadd.f32 %v2552_v59, %v2251_v30 }
 0x35e   : > { %v2578_v33 = vadd.f32 %v2828_v48, %v2566_v8 }
 0x360   : > { %v2586_v29 = vmax.f32 %v2578_v33, 0.0 }
 0x362   : > { %2594 = vxpose.xlu1.b32.cont [5/8] (short) (narrow) %v2586_v29, 8 }
 0x363   : > { %v2554_v1 = vpop.f32.mrf.mxu1 }
 0x364   : > { %v2567_v52 = vadd.f32 %v2554_v1, %v2253_v14 }
 0x366   : > { %v2579_v32 = vadd.f32 %v2828_v48, %v2567_v52 }
 0x368   : > { %v2587_v15 = vmax.f32 %v2579_v32, 0.0  ;;  %v2255_v60 = vpop.f32.mrf.mxu0 }
 0x36a   : > { %2595 = vxpose.xlu1.b32.cont [6/8] (short) (narrow) %v2587_v15, 8 }
 0x370   : > { %v2182_v16 = vpop.f32.mrf.mxu3  ;;  %v2257_v22 = vpop.f32.mrf.mxu0 }
 0x371   : > { %v2256_v23 = vadd.f32 %v2255_v60, %v2182_v16 }
 0x377   : > { %v2557_v9 = vpop.f32.mrf.mxu1 }
 0x378   : > { %v2568_v26 = vadd.f32 %v2557_v9, %v2256_v23  ;;  %v2184_v3 = vpop.f32.mrf.mxu3 }
 0x379   : > { %v2258_v41 = vadd.f32 %v2257_v22, %v2184_v3 }
 0x37a   : > { %v2580_v35 = vadd.f32 %v2828_v48, %v2568_v26 }
 0x37c   : > { %v2588_v27 = vmax.f32 %v2580_v35, 0.0 }
 0x37e   : > { %2596 = vxpose.xlu1.b32.cont [7/8] (short) (narrow) %v2588_v27, 8 }
 0x37f   : > { %v2559_v61 = vpop.f32.mrf.mxu1 }
 0x380   : > { %v2569_v47 = vadd.f32 %v2559_v61, %v2258_v41 }
 0x382   : > { %v2581_v55 = vadd.f32 %v2828_v48, %v2569_v47 }
 0x384   : > { %v2589_v24 = vmax.f32 %v2581_v55, 0.0 }
 0x386   : > { %2597 = vxpose.xlu1.b32.end [8/8] (short) (narrow) %v2589_v24, 8 }
 0x3f2   : > { %v2606_v37 = vpop.trf.xlu1 }
 0x3f3   : > { %2623 = vst.msk [vmem:[%s222_s11] sm:$0xff] %vm2622_vm1, %v2606_v37 }
 0x3f4 PF: > { %s15_s18 = sadd.s32 1, %s2837_s18  }
 0x3f5   : > { %p12_p4 = scmp.ge.s32.totalorder %s15_s18, 4  }
 0x3f7   :  { %14 = sbr.rel (!%p12_p4) target bundleno = 1 (0x1), region = 80 }

</bundles_post_ra>
